<compile_context>
chip_gen: v6e
topology: v6e:2x2x1
jax: 0.10.0
libtpu: 0.0.40
codegen_flags: <defaults>
</compile_context>

<pallas_src>
import functools

import jax
import jax.numpy as jnp
from jax import lax
from jax.experimental import pallas as pl
from jax.experimental.pallas import tpu as pltpu


def _cross_attention_kernel(xl_ref, xg_ref, p_ref, const_ref, out_ref,
                            m_sc, l_sc, acc_sc, *, C, band):
    """Grid = (batch, key_chunk).

    xl_ref  : (C, N)   local tokens (queries), channel-major, resident per batch elem
    xg_ref  : (C, KC)  global-token key chunk, channel-major
    p_ref   : (3*band+2, C) packed parameters:
                rows [0, C)             : Wq  (out, in)
                rows [band, band+C)     : Wk  (out, in)   (bk dropped — cancels in softmax)
                rows [2*band, 2*band+C) : bq, lane-broadcast (column slice -> (C, 1))
                row  3*band             : wvu = Wv^T Wo^T wc  (folded value path)
                row  3*band+1           : wc conv weight row  (folded residual path)
    const_ref : (1,) SMEM scalar  bv.(Wo^T wc) + bo.wc + bc
    out_ref : (1, N)   lane-dense output row for this batch element
    m_sc / l_sc / acc_sc : (1, N) online-softmax running max / denom / numerator
    """
    j = pl.program_id(1)

    @pl.when(j == 0)
    def _init():
        m_sc[...] = jnp.full_like(m_sc, -jnp.inf)
        l_sc[...] = jnp.zeros_like(l_sc)
        acc_sc[...] = jnp.zeros_like(acc_sc)

    wq = p_ref[0:C, :]                               # (C, C)
    wk = p_ref[band:band + C, :]                     # (C, C)
    bq_col = p_ref[2 * band:2 * band + C, 0:1]       # (C, 1), no relayout needed
    wvu = p_ref[3 * band:3 * band + 1, :]            # (1, C)

    xl = xl_ref[...]                                 # (C, N)
    xg_c = xg_ref[...]                               # (C, KC)

    # Query path (depends only on the batch element; recomputing it per key chunk is a
    # tiny (C,C)x(C,N) matmul and avoids an extra scratch buffer).
    q_t = jnp.dot(wq, xl, preferred_element_type=jnp.float32) + bq_col        # (C, N)
    # Key chunk and folded (rank-1) value row for this chunk.
    k_c = jnp.dot(wk, xg_c, preferred_element_type=jnp.float32)               # (C, KC)
    vu_c = jnp.dot(wvu, xg_c, preferred_element_type=jnp.float32)             # (1, KC)

    # Scores, keys on sublanes / queries on lanes: s[m, n] = k_c[:, m] . q_t[:, n].
    # K = C is tiny so MXU contraction utilization is low, but the EUP exp below is
    # the binding unit — kept in f32 for exact parity (bf16 operands not adopted).
    s = lax.dot_general(k_c, q_t, (((0,), (0,)), ((), ())),
                        preferred_element_type=jnp.float32)                   # (KC, N)

    # Online softmax over the key (sublane) axis; all stats stay lane-dense (1, N).
    m_prev = m_sc[...]
    m_new = jnp.maximum(m_prev, jnp.max(s, axis=0, keepdims=True))            # (1, N)
    alpha = jnp.exp(m_prev - m_new)
    e = jnp.exp(s - m_new)                                                    # (KC, N)
    l_sc[...] = alpha * l_sc[...] + jnp.sum(e, axis=0, keepdims=True)
    acc_sc[...] = alpha * acc_sc[...] + jnp.dot(vu_c, e,
                                                preferred_element_type=jnp.float32)
    m_sc[...] = m_new

    @pl.when(j == pl.num_programs(1) - 1)
    def _finalize():
        wc_row = p_ref[3 * band + 1:3 * band + 2, :]                          # (1, C)
        conv_row = jnp.dot(wc_row, xl, preferred_element_type=jnp.float32)    # (1, N)
        # NOTE: `const` folds the value-bias term only because it is added OUTSIDE the
        # normalized product (softmax rows sum to 1); do not move it inside.
        inv_l = pl.reciprocal(l_sc[...], approx=False)   # exact; a (1, N) row is cheap
        out_ref[...] = (conv_row + acc_sc[...] * inv_l
                        + const_ref[0]).astype(out_ref.dtype)


def _round_up(x, m):
    return ((x + m - 1) // m) * m


def _fold_params(params):
    """Fold Wo/bo, Wv/bv and the 1x1 conv into rank-1 vectors + one scalar, then pack
    all small per-channel parameters into one sublane-aligned slab (single DMA).

    bk is dropped entirely: adding bk to every key shifts each query's score row by a
    per-query constant, which the softmax over keys cancels exactly.
    """
    (wq, bq), (wk, bk), (wv, bv), (wo, bo), (wc, bc) = params
    del bk  # exactly cancelled by the softmax over keys
    C = wq.shape[0]
    band = _round_up(C, 8)                            # sublane-aligned row bands

    wc_vec = wc.reshape(C).astype(jnp.float32)        # conv weight (1, C, 1, 1) -> (C,)
    # Elementwise (exact f32) rank-1 folds — no dependence on default matmul precision.
    u = jnp.sum(wo.astype(jnp.float32) * wc_vec[:, None], axis=0)      # Wo^T wc
    wvu = jnp.sum(wv.astype(jnp.float32) * u[:, None], axis=0)         # Wv^T Wo^T wc
    const = (jnp.sum(bv.astype(jnp.float32) * u)
             + jnp.sum(bo.astype(jnp.float32) * wc_vec)
             + bc[0].astype(jnp.float32)).reshape(1)

    rows = 3 * band + 2
    slab = jnp.zeros((rows, C), jnp.float32)
    slab = slab.at[0:C, :].set(wq.astype(jnp.float32))
    slab = slab.at[band:band + C, :].set(wk.astype(jnp.float32))
    slab = slab.at[2 * band:2 * band + C, :].set(
        jnp.broadcast_to(bq.astype(jnp.float32)[:, None], (C, C)))     # lane-broadcast bq
    slab = slab.at[3 * band, :].set(wvu)
    slab = slab.at[3 * band + 1, :].set(wc_vec)
    return slab, const, band


def cross_attention(local_feat, global_feat, params, *, key_chunk=512):
    """local_feat, global_feat: (B, C, H, W) float32.  Returns (B, 1, H, W)."""
    B, C, H, W = local_feat.shape
    N = H * W

    # Both operands stay channel-major (B, C, N): free reshapes, no wrapper HBM
    # transpose, no lane-padded (N, C) token-major tile.
    xl = local_feat.reshape(B, C, N)
    xg = global_feat.reshape(B, C, N)

    slab, const, band = _fold_params(params)
    rows = slab.shape[0]

    # Key-axis chunking (second grid axis + online softmax) bounds the live (KC, N)
    # score slab and the resident global tile — what keeps the kernel inside VMEM at
    # large N (esp. v7x, 64 MiB physical).  At N=256 this is a single chunk.
    if key_chunk < N and N % key_chunk == 0 and key_chunk % 128 == 0:
        kc = key_chunk
    else:
        # TODO(synk): ragged key-tail handling when key_chunk does not divide N.
        kc = N
    n_chunks = N // kc

    kernel = functools.partial(_cross_attention_kernel, C=C, band=band)

    out = pl.pallas_call(
        kernel,
        out_shape=jax.ShapeDtypeStruct((B, 1, N), jnp.float32),
        grid=(B, n_chunks),
        in_specs=[
            pl.BlockSpec((None, C, N), lambda b, j: (b, 0, 0)),    # local (queries)
            pl.BlockSpec((None, C, kc), lambda b, j: (b, 0, j)),   # global key chunk
            pl.BlockSpec((rows, C), lambda b, j: (0, 0)),          # packed param slab
            pl.BlockSpec(memory_space=pltpu.MemorySpace.SMEM),     # folded scalar const
        ],
        out_specs=pl.BlockSpec((None, 1, N), lambda b, j: (b, 0, 0)),
        scratch_shapes=[pltpu.VMEM((1, N), jnp.float32),   # running max
                        pltpu.VMEM((1, N), jnp.float32),   # running denom
                        pltpu.VMEM((1, N), jnp.float32)],  # running numerator
        # Batch axis "parallel": on v7x each TensorCore takes one batch element.
        # (Folding the batch would save ~0.35 us/step on single-TC v5e/v6e but would
        #  serialize v7x, which is the larger effect.)
        # No vmem_limit_bytes: per-step footprint is far below the default scoped VMEM.
        compiler_params=pltpu.CompilerParams(
            dimension_semantics=("parallel", "arbitrary")),
    )(xl, xg, slab, const)

    return out.reshape(B, 1, H, W)


def cross_attention_ref(local_feat, global_feat, params):
    """Pure-JAX reference mirroring the PyTorch forward (unfused)."""
    B, C, H, W = local_feat.shape
    N = H * W
    xl = jnp.transpose(local_feat.reshape(B, C, N), (0, 2, 1))
    xg = jnp.transpose(global_feat.reshape(B, C, N), (0, 2, 1))
    (wq, bq), (wk, bk), (wv, bv), (wo, bo), (wc, bc) = params
    q = xl @ wq.T + bq
    k = xg @ wk.T + bk
    v = xg @ wv.T + bv
    attn = jax.nn.softmax(jnp.einsum('bnc,bmc->bnm', q, k), axis=-1)
    o = jnp.einsum('bnm,bmc->bnc', attn, v) @ wo.T + bo
    res = xl + o                                              # (B, N, C)
    out = res @ wc.reshape(1, C).T + bc                       # (B, N, 1)
    return jnp.transpose(out, (0, 2, 1)).reshape(B, 1, H, W)


def init_params(key, dim_in):
    """Deterministic synthetic parameters matching nn.Linear / nn.Conv2d shapes."""
    keys = jax.random.split(key, 10)
    scale = 1.0 / jnp.sqrt(dim_in)

    def lin(kw, kb):
        w = jax.random.uniform(kw, (dim_in, dim_in), jnp.float32, -scale, scale)
        b = jax.random.uniform(kb, (dim_in,), jnp.float32, -scale, scale)
        return w, b

    wq = lin(keys[0], keys[1])
    wk = lin(keys[2], keys[3])
    wv = lin(keys[4], keys[5])
    wo = lin(keys[6], keys[7])
    # Conv2d(dim_in, 1, kernel_size=1): weight (1, C, 1, 1), bias (1,)
    wc = jax.random.uniform(keys[8], (1, dim_in, 1, 1), jnp.float32, -scale, scale)
    bc = jax.random.uniform(keys[9], (1,), jnp.float32, -scale, scale)
    return wq, wk, wv, wo, (wc, bc)


if __name__ == "__main__":
    B, C, H, W = 2, 4, 16, 16
    key = jax.random.PRNGKey(0)
    k1, k2, k3 = jax.random.split(key, 3)

    local_feat = jax.random.normal(k1, (B, C, H, W), jnp.float32)
    global_feat = jax.random.normal(k2, (B, C, H, W), jnp.float32)
    params = init_params(k3, C)

    out = cross_attention(local_feat, global_feat, params)
    out = jax.block_until_ready(out)

    ref = cross_attention_ref(local_feat, global_feat, params)
    assert out.shape == (B, 1, H, W)
    # Tolerance covers the default-precision matmuls inside the pure-JAX reference and
    # the re-associated (algebraically folded) summation order in the kernel.
    assert jnp.allclose(out, ref, atol=2e-3, rtol=2e-3), \
        f"mismatch: max abs err {jnp.max(jnp.abs(out - ref))}"

    # Also exercise the multi-chunk online-softmax path (2 key chunks at N=256).
    out_chunked = jax.block_until_ready(
        cross_attention(local_feat, global_feat, params, key_chunk=128))
    assert jnp.allclose(out_chunked, ref, atol=2e-3, rtol=2e-3), \
        f"chunked mismatch: max abs err {jnp.max(jnp.abs(out_chunked - ref))}"

    print("KERNEL_OK")
</pallas_src>

<mosaic_0001>
module attributes {stable_mosaic.version = 11 : i64} {
  func.func @_cross_attention_kernel(%arg0: i32, %arg1: i32, %arg2: memref<1x4x256xf32, #tpu.memory_space<vmem>>, %arg3: memref<1x4x256xf32, #tpu.memory_space<vmem>>, %arg4: memref<26x4xf32, #tpu.memory_space<vmem>>, %arg5: memref<1xf32, #tpu.memory_space<smem>>, %arg6: memref<1x1x256xf32, #tpu.memory_space<vmem>>, %arg7: memref<1x256xf32, #tpu.memory_space<vmem>>, %arg8: memref<1x256xf32, #tpu.memory_space<vmem>>, %arg9: memref<1x256xf32, #tpu.memory_space<vmem>>) attributes {dimension_semantics = [#tpu.dimension_semantics<parallel>, #tpu.dimension_semantics<arbitrary>], iteration_bounds = array<i64: 2, 1>, scalar_prefetch = 0 : i64, scratch_operands = 3 : i64, tpu.core_type = #tpu.core_type<tc>, window_params = [{transform_indices = @transform_0, window_bounds = array<i64: 1, 4, 256>}, {transform_indices = @transform_1, window_bounds = array<i64: 1, 4, 256>}, {pipeline_mode = #tpu.pipeline_mode<synchronous>, transform_indices = @transform_2, window_bounds = array<i64: 26, 4>}, {transform_indices = @transform_3, window_bounds = array<i64: 1>}, {transform_indices = @transform_4, window_bounds = array<i64: 1, 1, 256>}]} {
    %c0_i32 = arith.constant 0 : i32
    %0 = arith.cmpi eq, %arg1, %c0_i32 : i32
    %1 = arith.extui %0 : i1 to i32
    %c0_i32_0 = arith.constant 0 : i32
    %2 = arith.cmpi ne, %1, %c0_i32_0 : i32
    scf.if %2 {
      %cst_31 = arith.constant 0xFF800000 : f32
      %41 = vector.broadcast %cst_31 : f32 to vector<1x256xf32>
      %c0_32 = arith.constant 0 : index
      %c0_33 = arith.constant 0 : index
      %42 = vector.load %arg7[%c0_32, %c0_33] : memref<1x256xf32, #tpu.memory_space<vmem>>, vector<1x256xf32>
      tpu.vector_store %arg7[%c0_32, %c0_33], %41 {strides = array<i32>} : memref<1x256xf32, #tpu.memory_space<vmem>>, vector<1x256xf32>,
      %cst_34 = arith.constant 0.000000e+00 : f32
      %43 = vector.broadcast %cst_34 : f32 to vector<1x256xf32>
      %c0_35 = arith.constant 0 : index
      %c0_36 = arith.constant 0 : index
      %44 = vector.load %arg8[%c0_35, %c0_36] : memref<1x256xf32, #tpu.memory_space<vmem>>, vector<1x256xf32>
      tpu.vector_store %arg8[%c0_35, %c0_36], %43 {strides = array<i32>} : memref<1x256xf32, #tpu.memory_space<vmem>>, vector<1x256xf32>,
      %cst_37 = arith.constant 0.000000e+00 : f32
      %45 = vector.broadcast %cst_37 : f32 to vector<1x256xf32>
      %c0_38 = arith.constant 0 : index
      %c0_39 = arith.constant 0 : index
      %46 = vector.load %arg9[%c0_38, %c0_39] : memref<1x256xf32, #tpu.memory_space<vmem>>, vector<1x256xf32>
      tpu.vector_store %arg9[%c0_38, %c0_39], %45 {strides = array<i32>} : memref<1x256xf32, #tpu.memory_space<vmem>>, vector<1x256xf32>,
    } else {
    }
    %c0 = arith.constant 0 : index
    %c0_1 = arith.constant 0 : index
    %3 = vector.load %arg4[%c0, %c0_1] : memref<26x4xf32, #tpu.memory_space<vmem>>, vector<4x4xf32>
    %c8 = arith.constant 8 : index
    %c0_2 = arith.constant 0 : index
    %4 = vector.load %arg4[%c8, %c0_2] : memref<26x4xf32, #tpu.memory_space<vmem>>, vector<4x4xf32>
    %c16 = arith.constant 16 : index
    %c0_3 = arith.constant 0 : index
    %5 = vector.load %arg4[%c16, %c0_3] : memref<26x4xf32, #tpu.memory_space<vmem>>, vector<4x1xf32>
    %c24 = arith.constant 24 : index
    %c0_4 = arith.constant 0 : index
    %6 = vector.load %arg4[%c24, %c0_4] : memref<26x4xf32, #tpu.memory_space<vmem>>, vector<1x4xf32>
    %c0_5 = arith.constant 0 : index
    %c0_6 = arith.constant 0 : index
    %c0_7 = arith.constant 0 : index
    %7 = vector.load %arg2[%c0_5, %c0_6, %c0_7] : memref<1x4x256xf32, #tpu.memory_space<vmem>>, vector<1x4x256xf32>
    %8 = vector.shape_cast %7 : vector<1x4x256xf32> to vector<4x256xf32>
    %c0_8 = arith.constant 0 : index
    %c0_9 = arith.constant 0 : index
    %c0_10 = arith.constant 0 : index
    %9 = vector.load %arg3[%c0_8, %c0_9, %c0_10] : memref<1x4x256xf32, #tpu.memory_space<vmem>>, vector<1x4x256xf32>
    %10 = vector.shape_cast %9 : vector<1x4x256xf32> to vector<4x256xf32>
    %cst = arith.constant dense<0.000000e+00> : vector<4x256xf32>
    %11 = tpu.matmul %3, %8, %cst {dimension_numbers = #tpu.dot_dimension_numbers<[1], [0], [0], [1], [0, 0, 1, 1], [], []>} : vector<4x4xf32>, vector<4x256xf32>, vector<4x256xf32> -> vector<4x256xf32>
    %12 = vector.broadcast %5 : vector<4x1xf32> to vector<4x256xf32>
    %13 = arith.addf %11, %12 : vector<4x256xf32>
    %cst_11 = arith.constant dense<0.000000e+00> : vector<4x256xf32>
    %14 = tpu.matmul %4, %10, %cst_11 {dimension_numbers = #tpu.dot_dimension_numbers<[1], [0], [0], [1], [0, 0, 1, 1], [], []>} : vector<4x4xf32>, vector<4x256xf32>, vector<4x256xf32> -> vector<4x256xf32>
    %cst_12 = arith.constant dense<0.000000e+00> : vector<1x256xf32>
    %15 = tpu.matmul %6, %10, %cst_12 {dimension_numbers = #tpu.dot_dimension_numbers<[1], [0], [0], [1], [0, 0, 1, 1], [], []>} : vector<1x4xf32>, vector<4x256xf32>, vector<1x256xf32> -> vector<1x256xf32>
    %cst_13 = arith.constant dense<0.000000e+00> : vector<256x256xf32>
    %16 = tpu.matmul %14, %13, %cst_13 {dimension_numbers = #tpu.dot_dimension_numbers<[0], [0], [1], [1], [0, 1, 1, 1], [], []>} : vector<4x256xf32>, vector<4x256xf32>, vector<256x256xf32> -> vector<256x256xf32>
    %c0_14 = arith.constant 0 : index
    %c0_15 = arith.constant 0 : index
    %17 = vector.load %arg7[%c0_14, %c0_15] : memref<1x256xf32, #tpu.memory_space<vmem>>, vector<1x256xf32>
    %cst_16 = arith.constant dense<0xFF800000> : vector<256xf32>
    %18 = vector.multi_reduction <maximumf>, %16, %cst_16 [0] : vector<256x256xf32> to vector<256xf32>
    %19 = vector.shape_cast %18 : vector<256xf32> to vector<1x256xf32>
    %20 = arith.maximumf %17, %19 : vector<1x256xf32>
    %21 = arith.subf %17, %20 : vector<1x256xf32>
    %22 = math.exp %21 : vector<1x256xf32>
    %23 = vector.broadcast %20 : vector<1x256xf32> to vector<256x256xf32>
    %24 = arith.subf %16, %23 : vector<256x256xf32>
    %25 = math.exp %24 : vector<256x256xf32>
    %c0_17 = arith.constant 0 : index
    %c0_18 = arith.constant 0 : index
    %26 = vector.load %arg8[%c0_17, %c0_18] : memref<1x256xf32, #tpu.memory_space<vmem>>, vector<1x256xf32>
    %27 = arith.mulf %22, %26 : vector<1x256xf32>
    %cst_19 = arith.constant dense<0.000000e+00> : vector<256xf32>
    %28 = vector.multi_reduction <add>, %25, %cst_19 [0] : vector<256x256xf32> to vector<256xf32>
    %29 = vector.shape_cast %28 : vector<256xf32> to vector<1x256xf32>
    %30 = arith.addf %27, %29 : vector<1x256xf32>
    %c0_20 = arith.constant 0 : index
    %c0_21 = arith.constant 0 : index
    %31 = vector.load %arg8[%c0_20, %c0_21] : memref<1x256xf32, #tpu.memory_space<vmem>>, vector<1x256xf32>
    tpu.vector_store %arg8[%c0_20, %c0_21], %30 {strides = array<i32>} : memref<1x256xf32, #tpu.memory_space<vmem>>, vector<1x256xf32>,
    %c0_22 = arith.constant 0 : index
    %c0_23 = arith.constant 0 : index
    %32 = vector.load %arg9[%c0_22, %c0_23] : memref<1x256xf32, #tpu.memory_space<vmem>>, vector<1x256xf32>
    %33 = arith.mulf %22, %32 : vector<1x256xf32>
    %cst_24 = arith.constant dense<0.000000e+00> : vector<1x256xf32>
    %34 = tpu.matmul %15, %25, %cst_24 {dimension_numbers = #tpu.dot_dimension_numbers<[1], [0], [0], [1], [0, 0, 1, 1], [], []>} : vector<1x256xf32>, vector<256x256xf32>, vector<1x256xf32> -> vector<1x256xf32>
    %35 = arith.addf %33, %34 : vector<1x256xf32>
    %c0_25 = arith.constant 0 : index
    %c0_26 = arith.constant 0 : index
    %36 = vector.load %arg9[%c0_25, %c0_26] : memref<1x256xf32, #tpu.memory_space<vmem>>, vector<1x256xf32>
    tpu.vector_store %arg9[%c0_25, %c0_26], %35 {strides = array<i32>} : memref<1x256xf32, #tpu.memory_space<vmem>>, vector<1x256xf32>,
    %c0_27 = arith.constant 0 : index
    %c0_28 = arith.constant 0 : index
    %37 = vector.load %arg7[%c0_27, %c0_28] : memref<1x256xf32, #tpu.memory_space<vmem>>, vector<1x256xf32>
    tpu.vector_store %arg7[%c0_27, %c0_28], %20 {strides = array<i32>} : memref<1x256xf32, #tpu.memory_space<vmem>>, vector<1x256xf32>,
    %c0_i32_29 = arith.constant 0 : i32
    %38 = arith.cmpi eq, %arg1, %c0_i32_29 : i32
    %39 = arith.extui %38 : i1 to i32
    %c0_i32_30 = arith.constant 0 : i32
    %40 = arith.cmpi ne, %39, %c0_i32_30 : i32
    scf.if %40 {
      %c25 = arith.constant 25 : index
      %c0_31 = arith.constant 0 : index
      %41 = vector.load %arg4[%c25, %c0_31] : memref<26x4xf32, #tpu.memory_space<vmem>>, vector<1x4xf32>
      %cst_32 = arith.constant dense<0.000000e+00> : vector<1x256xf32>
      %42 = tpu.matmul %41, %8, %cst_32 {dimension_numbers = #tpu.dot_dimension_numbers<[1], [0], [0], [1], [0, 0, 1, 1], [], []>} : vector<1x4xf32>, vector<4x256xf32>, vector<1x256xf32> -> vector<1x256xf32>
      %c0_33 = arith.constant 0 : index
      %c0_34 = arith.constant 0 : index
      %43 = vector.load %arg8[%c0_33, %c0_34] : memref<1x256xf32, #tpu.memory_space<vmem>>, vector<1x256xf32>
      %44 = tpu.reciprocal %43 : vector<1x256xf32> -> vector<1x256xf32>
      %c0_35 = arith.constant 0 : index
      %c0_36 = arith.constant 0 : index
      %45 = vector.load %arg9[%c0_35, %c0_36] : memref<1x256xf32, #tpu.memory_space<vmem>>, vector<1x256xf32>
      %46 = arith.mulf %45, %44 : vector<1x256xf32>
      %47 = arith.addf %42, %46 : vector<1x256xf32>
      %c0_37 = arith.constant 0 : index
      %48 = memref.load %arg5[%c0_37] : memref<1xf32, #tpu.memory_space<smem>>
      %49 = vector.broadcast %48 : f32 to vector<1x256xf32>
      %50 = arith.addf %47, %49 : vector<1x256xf32>
      %c0_38 = arith.constant 0 : index
      %c0_39 = arith.constant 0 : index
      %c0_40 = arith.constant 0 : index
      %51 = vector.load %arg6[%c0_38, %c0_39, %c0_40] : memref<1x1x256xf32, #tpu.memory_space<vmem>>, vector<1x1x256xf32>
      %52 = vector.shape_cast %51 : vector<1x1x256xf32> to vector<1x256xf32>
      %53 = vector.shape_cast %50 : vector<1x256xf32> to vector<1x1x256xf32>
      tpu.vector_store %arg6[%c0_38, %c0_39, %c0_40], %53 {strides = array<i32>} : memref<1x1x256xf32, #tpu.memory_space<vmem>>, vector<1x1x256xf32>,
    } else {
    }
    return
  }
  func.func @transform_0(%arg0: i32, %arg1: i32) -> (i32, i32, i32) {
    %c0_i32 = arith.constant 0 : i32
    %c0_i32_0 = arith.constant 0 : i32
    %c0_i32_1 = arith.constant 0 : i32
    return %arg0, %c0_i32, %c0_i32_0 : i32, i32, i32
  }
  func.func @transform_1(%arg0: i32, %arg1: i32) -> (i32, i32, i32) {
    %c0_i32 = arith.constant 0 : i32
    %c0_i32_0 = arith.constant 0 : i32
    return %arg0, %c0_i32, %arg1 : i32, i32, i32
  }
  func.func @transform_2(%arg0: i32, %arg1: i32) -> (i32, i32) {
    %c0_i32 = arith.constant 0 : i32
    %c0_i32_0 = arith.constant 0 : i32
    %c0_i32_1 = arith.constant 0 : i32
    return %c0_i32, %c0_i32_0 : i32, i32
  }
  func.func @transform_3(%arg0: i32, %arg1: i32) -> i32 {
    %c0_i32 = arith.constant 0 : i32
    %c0_i32_0 = arith.constant 0 : i32
    return %c0_i32 : i32
  }
  func.func @transform_4(%arg0: i32, %arg1: i32) -> (i32, i32, i32) {
    %c0_i32 = arith.constant 0 : i32
    %c0_i32_0 = arith.constant 0 : i32
    %c0_i32_1 = arith.constant 0 : i32
    return %arg0, %c0_i32, %c0_i32_0 : i32, i32, i32
  }
}

</mosaic_0001>

<bundles_post_ra>
// kernel: tpu_custom_call.1
= control target key start
LH: loop header
LB: loop body
LE: loop exit
PB: predicated region body
PF: predicated region fallthrough
CT: control target
= control target key end

     0   :  { %s2782_s0 = inlined_call_operand.vmem [shape: f32[2,4,256], index: 0, kind: input, shape index: {}]   ;;  %s2783_s1 = inlined_call_operand.vmem [shape: f32[2,4,256], index: 1, kind: input, shape index: {}]   ;;  %s2784_s2 = inlined_call_operand.vmem [shape: f32[26,4], index: 2, kind: input, shape index: {}]   ;;  %s2785_s3 = inlined_call_operand.<no memory space> [shape: f32[1], index: 3, kind: input, shape index: {}]   ;;  %s2786_s4 = inlined_call_operand.hbm [shape: f32[2,1,256], index: 4, kind: output, shape index: {}]  }
   0x1   :  { %9 = sst [smem:[#allocation5]] %s2785_s3 }
   0x2   :  { %10 = vsyncpa [#allocation7], 0 }
   0x3   :  { %12 = vsyncpa [#allocation7 + $0x1], 0  ;;  %s2006_s17 = smov 0   ;;  %s2008_s18 = smov 0  }
   0x4   :  { %s2010_s19 = smov 0   ;;  %s2012_s20 = smov 0  }
   0x5   :  { %s2014_s21 = smov 0   ;;  %s2016_s22 = smov 0  }
   0x6 LB: > { %s1636_s3 = sadd.s32 4294967295, %s1971_s22   ;;  %s1637_s23 = sadd.s32 4294967294, %s1971_s22   ;;  %s1971_s22 = sphi %s2016_s22, %s18_s22   ;;  %s1967_s21 = sphi %s2014_s21, %s2882_s21   ;;  %s1963_s20 = sphi %s2012_s20, %s2881_s20   ;;  %s1959_s19 = sphi %s2010_s19, %s2880_s19   ;;  %s1955_s18 = sphi %s2008_s18, %s2879_s18   ;;  %s1951_s17 = sphi %s2006_s17, %s2878_s17  }
   0x7   : > { %s30_s24 = sadd.s32 1, %s1967_s21  ;;  %s133_s25 = sadd.s32 1, %s1959_s19 }
   0x8   : > { %p32_p0 = scmp.ge.s32.totalorder %s30_s24, 2  ;;  %p143_p1 = scmp.ne.s32.totalorder %s1959_s19, %s1955_s18 }
   0x9   : > { %p144_p2 = scmp.eq.s32.totalorder %s1636_s3, 1  ;;  %p149_p3 = scmp.ne.s32.totalorder %s1955_s18, %s1951_s17 }
   0xa   : > { %s2884_s24 = smov (%p32_p0, %s30_s24), 0  ;;  %p150_p5 = scmp.eq.s32.totalorder %s1637_s23, 1 }
   0xb   : > { %p2046_p4 = por %p144_p2, %p143_p1  ;;  %s130_s27 = ssub.s32 %s1967_s21, %s2884_s24 }
   0xc   : > { %p1640_p6 = scmp.ge.s32.totalorder %s1971_s22, 1  ;;  %p131_p7 = scmp.eq.s32.totalorder %s130_s27, 0 }
   0xd   : > { %p2053_p8 = por %p150_p5, %p149_p3  ;;  %p195_p9 = scmp.lt.s32.totalorder %s1971_s22, 3 }
   0xe   : > { %s2059_s29 = scalar_select %p131_p7, %s1959_s19, %s133_s25  }
   0xf   : > { %p196_p10 = pnand %p1640_p6, %p195_p9 }
  0x11   : > { %199 = sbr.rel (%p196_p10) target bundleno = 1050 (0x41a), region = 36 }
  0x16   : > { %p230_p11 = scmp.lt.s32.totalorder %s1963_s20, 1  ;;  %v2787_v0 = vmov 0.0   ;;  %v258_v1 = vld [vmem:[%s2784_s2 + $0x10] sm:$0xf]  ;;  %v1974_v2 = vmov 0   ;;  %vm273_vm0 = vcmask 1043456   ;;  %v2788_v55 = vlaneseq }
  0x17   : > { %342 = vmatprep.mubr.f32.mxu0 %v2787_v0  ;;  %733 = vmatprep.mubr.f32.mxu1 %v2787_v0  ;;  %v256_v7 = vld [vmem:[%s2784_s2] sm:$0xf]  ;;  %vm269_vm1 = vcmask 31744   ;;  %v257_v8 = vld [vmem:[%s2784_s2 + $0x8] sm:$0xf]  ;;  %v1975_v58 = vmov -inf  }
  0x18   : > { %s231_s6 = scalar_select %p230_p11, %s1963_s20, 1  ;;  %1759 = vset.pattern.permute.xlu0 %v1974_v2  ;;  %v259_v44 = vld [vmem:[%s2784_s2 + $0x18] sm:$0x1]  ;;  %vm2180_vm2 = vcmp.lt.s32.totalorder %v2788_v55, 256 }
  0x19   : > { %264 = vperm.xlu0 %1759, %v258_v1   ;;  %253 = vst.msk [vmem:[#allocation2] sm:$0x3] %vm2180_vm2, %v1975_v58  ;;  %254 = vst.msk [vmem:[#allocation3] sm:$0x3] %vm2180_vm2, %v2787_v0  ;;  %s1513_s5 = sld [smem:[#allocation5]]  ;;  %s1699_s8 = sshll.u32 %s1963_s20, 5 }
  0x1a   : > { %s1697_s7 = sshll.u32 %s231_s6, 3  ;;  %255 = vst.msk [vmem:[#allocation4] sm:$0x3] %vm2180_vm2, %v2787_v0  ;;  %s227_s6 = sand.u32 1, %s1955_s18  }
  0x1b   : > { %s2071_s10 = scalar_lea.vmem %s2782_s0, %s1697_s7  ;;  %s243_s13 = scalar_lea.vmem %s2783_s1, %s1697_s7 }
  0x1c   : > { %v260_v3 = vld [vmem:[%s2071_s10] sm:$0xff]  ;;  %s1641_s7 = sshll.u32 %s227_s6, 1  ;;  %s1537_s14 = scalar_lea.sflag [#allocation7], %s227_s6 }
  0x1d   : > { %v261_v4 = vld [vmem:[%s243_s13] sm:$0xff]  ;;  %v2077_v5 = vcombine.high %v260_v3, %v260_v3  ;;  %s229_s9 = scalar_lea.vmem [#allocation6], %s1641_s7  ;;  %s1549_s13 = scalar_lea.hbm %s2786_s4, %s1699_s8 }
  0x1e   : > { %v350_v6 = vcombine.high %v261_v4, %v261_v4  ;;  %s1977_s20 = smov [#allocation6]  }
  0x1f   : > { %2819 = vst [vmem:[#allocation9_spill] sm:$0xff] %v2077_v5  ;;  %1646 = vmatprep.subr.msk.mxu0 %vm273_vm0, %v2077_v5  ;;  %s1899_s16 = sshll.u32 %s1977_s20, 4  ;;  %s1900_s16 = int_to_ptr.vmem [resolvable:$false] %s1899_s16 }
  0x20   : > { %1647 = vmatpush1.msk.msra.mxu0 %vm273_vm0, %v260_v3  ;;  %s1901_s3 = scalar_lea.vmem %s1900_s16, 64 }
  0x21   : > { %1648 = vmatmul.mubr.msk.f32.vlgmr.msra.gmra.mxu0 %vm269_vm1, %v256_v7  ;;  %1649 = vmatprep.subr.msk.mxu0 %vm273_vm0, %v350_v6 }
  0x22   : > { %1650 = vmatpush1.msk.msra.mxu0 %vm273_vm0, %v261_v4  ;;  %422 = vmatprep.mubr.f32.mxu0 %v2787_v0 }
  0x23   : > { %1652 = vmatprep.subr.msk.mxu0 %vm273_vm0, %v350_v6 }
  0x25   : > { %1651 = vmatmul.mubr.msk.f32.vlgmr.msra.gmra.mxu0 %vm269_vm1, %v257_v8 }
  0x26   : > { %1653 = vmatpush1.msk.msra.mxu0 %vm273_vm0, %v261_v4  ;;  %496 = vmatprep.mubr.f32.mxu0 %v2787_v0 }
  0x29   : > { %1654 = vmatmul.mubr.msk.f32.vlgmr.msra.gmra.mxu0 %vm269_vm1, %v259_v44 }
  0x94   : > { %v265_v10 = vpop.permute.xlu0 %264 }
  0xe1   : > { %v344_v9 = vpop.f32.mrf.mxu0 }
  0xe2   : > { %v345_v13 = vadd.f32 %v344_v9, %v265_v10 }
  0xe3   : > { %v346_v11 = vpop.f32.mrf.mxu0 }
  0xe4   : > { %v347_v12 = vadd.f32 %v346_v11, %v265_v10 }
  0xe5   : > { %v424_v14 = vpop.f32.mrf.mxu0 }
  0xe6   : > { %503 = vxpose.xlu0.b32.start.end [1/1] (short) %v424_v14, 128  ;;  %1655 = vmatprep.subr.msk.mxu1 %vm273_vm0, %v347_v12 }
  0xe7   : > { %v426_v15 = vpop.f32.mrf.mxu0  ;;  %1656 = vmatpush1.msk.msra.mxu1 %vm273_vm0, %v345_v13 }
  0xe8   : > { %535 = vxpose.xlu1.b32.start.end [1/1] (short) %v426_v15, 128 }
 0x162   : > { %v519_v16 = vpop.trf.xlu0 }
 0x163   : > { %1657 = vmatmul.mubr.msk.f32.vlgmr.msra.gmra.mxu1 %vm269_vm1, %v519_v16 }
 0x164   : > { %739 = vmatprep.mubr.f32.mxu1 %v2787_v0  ;;  %v551_v25 = vpop.trf.xlu1 }
 0x166   : > { %v520_v17 = vpop.trf.xlu0 }
 0x167   : > { %1658 = vmatmul.mubr.msk.f32.gmra.mxu1 %vm269_vm1, %v520_v17 }
 0x168   : > { %745 = vmatprep.mubr.f32.mxu1 %v2787_v0  ;;  %v552_v27 = vpop.trf.xlu1 }
 0x16a   : > { %v521_v18 = vpop.trf.xlu0 }
 0x16b   : > { %1659 = vmatmul.mubr.msk.f32.gmra.mxu1 %vm269_vm1, %v521_v18 }
 0x16c   : > { %751 = vmatprep.mubr.f32.mxu1 %v2787_v0  ;;  %v553_v30 = vpop.trf.xlu1 }
 0x16e   : > { %v522_v19 = vpop.trf.xlu0 }
 0x16f   : > { %1660 = vmatmul.mubr.msk.f32.gmra.mxu1 %vm269_vm1, %v522_v19 }
 0x170   : > { %757 = vmatprep.mubr.f32.mxu1 %v2787_v0  ;;  %v554_v32 = vpop.trf.xlu1 }
 0x172   : > { %v523_v20 = vpop.trf.xlu0 }
 0x173   : > { %1661 = vmatmul.mubr.msk.f32.gmra.mxu1 %vm269_vm1, %v523_v20 }
 0x174   : > { %763 = vmatprep.mubr.f32.mxu1 %v2787_v0  ;;  %v555_v35 = vpop.trf.xlu1 }
 0x176   : > { %v524_v21 = vpop.trf.xlu0 }
 0x177   : > { %1662 = vmatmul.mubr.msk.f32.gmra.mxu1 %vm269_vm1, %v524_v21 }
 0x178   : > { %769 = vmatprep.mubr.f32.mxu1 %v2787_v0  ;;  %v556_v37 = vpop.trf.xlu1 }
 0x17a   : > { %v525_v22 = vpop.trf.xlu0 }
 0x17b   : > { %1663 = vmatmul.mubr.msk.f32.gmra.mxu1 %vm269_vm1, %v525_v22 }
 0x17c   : > { %775 = vmatprep.mubr.f32.mxu1 %v2787_v0  ;;  %v557_v38 = vpop.trf.xlu1 }
 0x17e   : > { %v526_v23 = vpop.trf.xlu0 }
 0x17f   : > { %1664 = vmatmul.mubr.msk.f32.gmra.mxu1 %vm269_vm1, %v526_v23 }
 0x180   : > { %781 = vmatprep.mubr.f32.mxu1 %v2787_v0  ;;  %v558_v39 = vpop.trf.xlu1 }
 0x182   : > { %v527_v24 = vpop.trf.xlu0 }
 0x183   : > { %1665 = vmatmul.mubr.msk.f32.gmra.mxu1 %vm269_vm1, %v527_v24 }
 0x184   : > { %787 = vmatprep.mubr.f32.mxu1 %v2787_v0  ;;  %v559_v40 = vpop.trf.xlu1 }
 0x186   : > { %v528_v26 = vpop.trf.xlu0 }
 0x187   : > { %1666 = vmatmul.mubr.msk.f32.gmra.mxu1 %vm269_vm1, %v528_v26 }
 0x188   : > { %793 = vmatprep.mubr.f32.mxu1 %v2787_v0  ;;  %v560_v41 = vpop.trf.xlu1 }
 0x18a   : > { %v529_v28 = vpop.trf.xlu0 }
 0x18b   : > { %1667 = vmatmul.mubr.msk.f32.gmra.mxu1 %vm269_vm1, %v529_v28 }
 0x18c   : > { %799 = vmatprep.mubr.f32.mxu1 %v2787_v0  ;;  %v561_v42 = vpop.trf.xlu1 }
 0x18e   : > { %v530_v29 = vpop.trf.xlu0 }
 0x18f   : > { %1668 = vmatmul.mubr.msk.f32.gmra.mxu1 %vm269_vm1, %v530_v29 }
 0x190   : > { %805 = vmatprep.mubr.f32.mxu1 %v2787_v0  ;;  %v562_v43 = vpop.trf.xlu1 }
 0x192   : > { %v531_v31 = vpop.trf.xlu0 }
 0x193   : > { %1669 = vmatmul.mubr.msk.f32.gmra.mxu1 %vm269_vm1, %v531_v31 }
 0x194   : > { %811 = vmatprep.mubr.f32.mxu1 %v2787_v0  ;;  %v563_v45 = vpop.trf.xlu1 }
 0x196   : > { %v532_v33 = vpop.trf.xlu0 }
 0x197   : > { %1670 = vmatmul.mubr.msk.f32.gmra.mxu1 %vm269_vm1, %v532_v33 }
 0x198   : > { %817 = vmatprep.mubr.f32.mxu1 %v2787_v0  ;;  %v564_v46 = vpop.trf.xlu1 }
 0x19a   : > { %v533_v34 = vpop.trf.xlu0 }
 0x19b   : > { %1671 = vmatmul.mubr.msk.f32.gmra.mxu1 %vm269_vm1, %v533_v34 }
 0x19c   : > { %823 = vmatprep.mubr.f32.mxu1 %v2787_v0  ;;  %v565_v47 = vpop.trf.xlu1 }
 0x19e   : > { %v534_v36 = vpop.trf.xlu0 }
 0x19f   : > { %1672 = vmatmul.mubr.msk.f32.gmra.mxu1 %vm269_vm1, %v534_v36 }
 0x1a0   : > { %829 = vmatprep.mubr.f32.mxu1 %v2787_v0  ;;  %v566_v48 = vpop.trf.xlu1 }
 0x1a3   : > { %1673 = vmatmul.mubr.msk.f32.gmra.mxu1 %vm269_vm1, %v551_v25 }
 0x1a4   : > { %835 = vmatprep.mubr.f32.mxu1 %v2787_v0 }
 0x1a7   : > { %1674 = vmatmul.mubr.msk.f32.gmra.mxu1 %vm269_vm1, %v552_v27 }
 0x1a8   : > { %841 = vmatprep.mubr.f32.mxu1 %v2787_v0 }
 0x1ab   : > { %1675 = vmatmul.mubr.msk.f32.gmra.mxu1 %vm269_vm1, %v553_v30 }
 0x1ac   : > { %847 = vmatprep.mubr.f32.mxu1 %v2787_v0 }
 0x1af   : > { %1676 = vmatmul.mubr.msk.f32.gmra.mxu1 %vm269_vm1, %v554_v32 }
 0x1b0   : > { %853 = vmatprep.mubr.f32.mxu1 %v2787_v0 }
 0x1b3   : > { %1677 = vmatmul.mubr.msk.f32.gmra.mxu1 %vm269_vm1, %v555_v35 }
 0x1b4   : > { %859 = vmatprep.mubr.f32.mxu1 %v2787_v0 }
 0x1b7   : > { %1678 = vmatmul.mubr.msk.f32.gmra.mxu1 %vm269_vm1, %v556_v37 }
 0x1b8   : > { %865 = vmatprep.mubr.f32.mxu1 %v2787_v0 }
 0x1bb   : > { %1679 = vmatmul.mubr.msk.f32.gmra.mxu1 %vm269_vm1, %v557_v38 }
 0x1bc   : > { %871 = vmatprep.mubr.f32.mxu1 %v2787_v0 }
 0x1bf   : > { %1680 = vmatmul.mubr.msk.f32.gmra.mxu1 %vm269_vm1, %v558_v39 }
 0x1c0   : > { %877 = vmatprep.mubr.f32.mxu1 %v2787_v0 }
 0x1c3   : > { %1681 = vmatmul.mubr.msk.f32.gmra.mxu1 %vm269_vm1, %v559_v40 }
 0x1c4   : > { %883 = vmatprep.mubr.f32.mxu1 %v2787_v0 }
 0x1c7   : > { %1682 = vmatmul.mubr.msk.f32.gmra.mxu1 %vm269_vm1, %v560_v41 }
 0x1c8   : > { %889 = vmatprep.mubr.f32.mxu1 %v2787_v0 }
 0x1cb   : > { %1683 = vmatmul.mubr.msk.f32.gmra.mxu1 %vm269_vm1, %v561_v42 }
 0x1cc   : > { %895 = vmatprep.mubr.f32.mxu1 %v2787_v0 }
 0x1cf   : > { %1684 = vmatmul.mubr.msk.f32.gmra.mxu1 %vm269_vm1, %v562_v43 }
 0x1d0   : > { %901 = vmatprep.mubr.f32.mxu1 %v2787_v0 }
 0x1d3   : > { %1685 = vmatmul.mubr.msk.f32.gmra.mxu1 %vm269_vm1, %v563_v45 }
 0x1d4   : > { %907 = vmatprep.mubr.f32.mxu1 %v2787_v0 }
 0x1d7   : > { %1686 = vmatmul.mubr.msk.f32.gmra.mxu1 %vm269_vm1, %v564_v46 }
 0x1d8   : > { %913 = vmatprep.mubr.f32.mxu1 %v2787_v0 }
 0x1db   : > { %1687 = vmatmul.mubr.msk.f32.gmra.mxu1 %vm269_vm1, %v565_v47 }
 0x1dc   : > { %919 = vmatprep.mubr.f32.mxu1 %v2787_v0 }
 0x1df   : > { %1688 = vmatmul.mubr.msk.f32.gmra.mxu1 %vm269_vm1, %v566_v48 }
 0x223   : > { %v2165_v49 = vpop.f32.mrf.mxu1 }
 0x225   : > { %v2167_v50 = vpop.f32.mrf.mxu1 }
 0x227   : > { %v2169_v51 = vpop.f32.mrf.mxu1 }
 0x229   : > { %v2171_v52 = vpop.f32.mrf.mxu1 }
 0x22b   : > { %v2173_v53 = vpop.f32.mrf.mxu1 }
 0x22c   : > { %v927_v39 = vmax.f32 %v2165_v49, %v2173_v53 }
 0x22d   : > { %v2175_v54 = vpop.f32.mrf.mxu1 }
 0x22e   : > { %v964_v42 = vmax.f32 %v2167_v50, %v2175_v54 }
 0x22f   : > { %v2177_v56 = vpop.f32.mrf.mxu1 }
 0x230   : > { %v928_v40 = vmax.f32 %v2169_v51, %v2177_v56 }
 0x231   : > { %v2192_v59 = vpop.f32.mrf.mxu1 }
 0x232   : > { %2822 = vst [vmem:[#allocation10_spill] sm:$0xff] %v2192_v59  ;;  %v965_v43 = vmax.f32 %v2171_v52, %v2192_v59 }
 0x233   : > { %v2194_v60 = vpop.f32.mrf.mxu1 }
 0x234   : > { %v929_v44 = vmax.f32 %v927_v39, %v2194_v60 }
 0x235   : > { %v2196_v61 = vpop.f32.mrf.mxu1 }
 0x236   : > { %v966_v47 = vmax.f32 %v964_v42, %v2196_v61 }
 0x237   : > { %v2198_v62 = vpop.f32.mrf.mxu1 }
 0x238   : > { %2823 = vst [vmem:[#allocation11_spill] sm:$0xff] %v2198_v62  ;;  %v930_v45 = vmax.f32 %v928_v40, %v2198_v62 }
 0x239   : > { %v2200_v63 = vpop.f32.mrf.mxu1 }
 0x23a   : > { %v967_v48 = vmax.f32 %v965_v43, %v2200_v63 }
 0x23b   : > { %v2202_v1 = vpop.f32.mrf.mxu1 }
 0x23c   : > { %v931_v58 = vmax.f32 %v929_v44, %v2202_v1 }
 0x23d   : > { %v2204_v2 = vpop.f32.mrf.mxu1 }
 0x23e   : > { %v968_v5 = vmax.f32 %v966_v47, %v2204_v2 }
 0x23f   : > { %v2206_v3 = vpop.f32.mrf.mxu1 }
 0x240   : > { %2824 = vst [vmem:[#allocation12_spill] sm:$0xff] %v2206_v3  ;;  %v932_v0 = vmax.f32 %v930_v45, %v2206_v3 }
 0x241   : > { %v2208_v4 = vpop.f32.mrf.mxu1 }
 0x242   : > { %v969_v59 = vmax.f32 %v967_v48, %v2208_v4 }
 0x243   : > { %v2210_v6 = vpop.f32.mrf.mxu1 }
 0x244   : > { %v933_v39 = vmax.f32 %v931_v58, %v2210_v6 }
 0x245   : > { %v2212_v7 = vpop.f32.mrf.mxu1 }
 0x246   : > { %v970_v42 = vmax.f32 %v968_v5, %v2212_v7 }
 0x247   : > { %v2214_v8 = vpop.f32.mrf.mxu1 }
 0x248   : > { %2825 = vst [vmem:[#allocation13_spill] sm:$0xff] %v2214_v8  ;;  %v934_v40 = vmax.f32 %v932_v0, %v2214_v8 }
 0x249   : > { %v2216_v9 = vpop.f32.mrf.mxu1 }
 0x24a   : > { %v971_v43 = vmax.f32 %v969_v59, %v2216_v9 }
 0x24b   : > { %v2218_v10 = vpop.f32.mrf.mxu1 }
 0x24c   : > { %v935_v44 = vmax.f32 %v933_v39, %v2218_v10 }
 0x24d   : > { %v2220_v11 = vpop.f32.mrf.mxu1 }
 0x24e   : > { %v972_v47 = vmax.f32 %v970_v42, %v2220_v11 }
 0x24f   : > { %v2222_v12 = vpop.f32.mrf.mxu1 }
 0x250   : > { %2826 = vst [vmem:[#allocation14_spill] sm:$0xff] %v2222_v12  ;;  %v936_v45 = vmax.f32 %v934_v40, %v2222_v12 }
 0x251   : > { %v2224_v13 = vpop.f32.mrf.mxu1 }
 0x252   : > { %v973_v48 = vmax.f32 %v971_v43, %v2224_v13 }
 0x253   : > { %v2226_v14 = vpop.f32.mrf.mxu1 }
 0x254   : > { %v937_v58 = vmax.f32 %v935_v44, %v2226_v14 }
 0x255   : > { %v2228_v15 = vpop.f32.mrf.mxu1 }
 0x256   : > { %v974_v5 = vmax.f32 %v972_v47, %v2228_v15 }
 0x257   : > { %v2230_v16 = vpop.f32.mrf.mxu1 }
 0x258   : > { %2827 = vst [vmem:[#allocation15_spill] sm:$0xff] %v2230_v16  ;;  %v938_v0 = vmax.f32 %v936_v45, %v2230_v16 }
 0x259   : > { %v2232_v17 = vpop.f32.mrf.mxu1 }
 0x25a   : > { %v975_v59 = vmax.f32 %v973_v48, %v2232_v17 }
 0x25b   : > { %v2234_v18 = vpop.f32.mrf.mxu1 }
 0x25c   : > { %v939_v39 = vmax.f32 %v937_v58, %v2234_v18 }
 0x25d   : > { %v2236_v19 = vpop.f32.mrf.mxu1 }
 0x25e   : > { %v976_v42 = vmax.f32 %v974_v5, %v2236_v19 }
 0x25f   : > { %v2238_v20 = vpop.f32.mrf.mxu1 }
 0x260   : > { %2828 = vst [vmem:[#allocation16_spill] sm:$0xff] %v2238_v20  ;;  %v940_v40 = vmax.f32 %v938_v0, %v2238_v20 }
 0x261   : > { %v2240_v21 = vpop.f32.mrf.mxu1 }
 0x262   : > { %v977_v43 = vmax.f32 %v975_v59, %v2240_v21 }
 0x263   : > { %v2242_v22 = vpop.f32.mrf.mxu1 }
 0x264   : > { %v941_v44 = vmax.f32 %v939_v39, %v2242_v22 }
 0x265   : > { %v2244_v23 = vpop.f32.mrf.mxu1 }
 0x266   : > { %v978_v47 = vmax.f32 %v976_v42, %v2244_v23 }
 0x267   : > { %v2246_v24 = vpop.f32.mrf.mxu1 }
 0x268   : > { %2829 = vst [vmem:[#allocation17_spill] sm:$0xff] %v2246_v24  ;;  %v942_v45 = vmax.f32 %v940_v40, %v2246_v24 }
 0x269   : > { %v2248_v25 = vpop.f32.mrf.mxu1 }
 0x26a   : > { %v979_v48 = vmax.f32 %v977_v43, %v2248_v25 }
 0x26b   : > { %v2250_v26 = vpop.f32.mrf.mxu1 }
 0x26c   : > { %v943_v58 = vmax.f32 %v941_v44, %v2250_v26 }
 0x26d   : > { %v2252_v27 = vpop.f32.mrf.mxu1 }
 0x26e   : > { %v980_v5 = vmax.f32 %v978_v47, %v2252_v27 }
 0x26f   : > { %v2254_v28 = vpop.f32.mrf.mxu1 }
 0x270   : > { %2830 = vst [vmem:[#allocation18_spill] sm:$0xff] %v2254_v28  ;;  %v944_v0 = vmax.f32 %v942_v45, %v2254_v28 }
 0x271   : > { %v2256_v29 = vpop.f32.mrf.mxu1 }
 0x272   : > { %v981_v59 = vmax.f32 %v979_v48, %v2256_v29 }
 0x273   : > { %v2258_v30 = vpop.f32.mrf.mxu1 }
 0x274   : > { %v945_v39 = vmax.f32 %v943_v58, %v2258_v30 }
 0x275   : > { %v2260_v31 = vpop.f32.mrf.mxu1 }
 0x276   : > { %v982_v42 = vmax.f32 %v980_v5, %v2260_v31 }
 0x277   : > { %v2262_v32 = vpop.f32.mrf.mxu1 }
 0x278   : > { %2831 = vst [vmem:[#allocation19_spill] sm:$0xff] %v2262_v32  ;;  %v946_v40 = vmax.f32 %v944_v0, %v2262_v32 }
 0x279   : > { %v2264_v33 = vpop.f32.mrf.mxu1 }
 0x27a   : > { %v983_v43 = vmax.f32 %v981_v59, %v2264_v33 }
 0x27b   : > { %v2266_v34 = vpop.f32.mrf.mxu1 }
 0x27c   : > { %v947_v44 = vmax.f32 %v945_v39, %v2266_v34 }
 0x27d   : > { %v2268_v35 = vpop.f32.mrf.mxu1 }
 0x27e   : > { %v984_v47 = vmax.f32 %v982_v42, %v2268_v35 }
 0x27f   : > { %v2270_v36 = vpop.f32.mrf.mxu1 }
 0x280   : > { %2832 = vst [vmem:[#allocation20_spill] sm:$0xff] %v2270_v36  ;;  %v948_v45 = vmax.f32 %v946_v40, %v2270_v36 }
 0x281   : > { %v2272_v37 = vpop.f32.mrf.mxu1 }
 0x282   : > { %v985_v48 = vmax.f32 %v983_v43, %v2272_v37 }
 0x283   : > { %v2274_v38 = vpop.f32.mrf.mxu1 }
 0x284   : > { %v949_v58 = vmax.f32 %v947_v44, %v2274_v38 }
 0x285   : > { %v2280_v41 = vpop.f32.mrf.mxu1 }
 0x286   : > { %v986_v5 = vmax.f32 %v984_v47, %v2280_v41 }
 0x287   : > { %v2288_v46 = vpop.f32.mrf.mxu1 }
 0x288   : > { %2833 = vst [vmem:[#allocation21_spill] sm:$0xff] %v2288_v46  ;;  %v950_v0 = vmax.f32 %v948_v45, %v2288_v46 }
 0x289   : > { %v2294_v55 = vpop.f32.mrf.mxu1 }
 0x28a   : > { %2834 = vst [vmem:[#allocation22_spill] sm:$0xff] %v2294_v55  ;;  %v987_v59 = vmax.f32 %v985_v48, %v2294_v55 }
 0x28b   : > { %v2300_v62 = vpop.f32.mrf.mxu1 }
 0x28c   : > { %2835 = vst [vmem:[#allocation23_spill] sm:$0xff] %v2300_v62  ;;  %v951_v39 = vmax.f32 %v949_v58, %v2300_v62 }
 0x28d   : > { %v2306_v3 = vpop.f32.mrf.mxu1 }
 0x28e   : > { %2836 = vst [vmem:[#allocation24_spill] sm:$0xff] %v2306_v3  ;;  %v988_v42 = vmax.f32 %v986_v5, %v2306_v3 }
 0x28f   : > { %v2312_v8 = vpop.f32.mrf.mxu1 }
 0x290   : > { %2837 = vst [vmem:[#allocation25_spill] sm:$0xff] %v2312_v8  ;;  %v952_v40 = vmax.f32 %v950_v0, %v2312_v8 }
 0x291   : > { %v2318_v12 = vpop.f32.mrf.mxu1 }
 0x292   : > { %2838 = vst [vmem:[#allocation26_spill] sm:$0xff] %v2318_v12  ;;  %v989_v43 = vmax.f32 %v987_v59, %v2318_v12 }
 0x293   : > { %v2324_v16 = vpop.f32.mrf.mxu1 }
 0x294   : > { %2839 = vst [vmem:[#allocation27_spill] sm:$0xff] %v2324_v16  ;;  %v953_v44 = vmax.f32 %v951_v39, %v2324_v16 }
 0x295   : > { %v2330_v20 = vpop.f32.mrf.mxu1 }
 0x296   : > { %2840 = vst [vmem:[#allocation28_spill] sm:$0xff] %v2330_v20  ;;  %v990_v47 = vmax.f32 %v988_v42, %v2330_v20  ;;  %v1976_v42 = vmov 1966171168  }
 0x297   : > { %v2336_v24 = vpop.f32.mrf.mxu1  ;;  %v1005_v20 = vunpack.c.l.s4 %v1976_v42 }
 0x298   : > { %2841 = vst [vmem:[#allocation29_spill] sm:$0xff] %v2336_v24  ;;  %v954_v45 = vmax.f32 %v952_v40, %v2336_v24 }
 0x299   : > { %v2342_v28 = vpop.f32.mrf.mxu1 }
 0x29a   : > { %2842 = vst [vmem:[#allocation30_spill] sm:$0xff] %v2342_v28  ;;  %v991_v48 = vmax.f32 %v989_v43, %v2342_v28 }
 0x29b   : > { %v2348_v32 = vpop.f32.mrf.mxu1 }
 0x29c   : > { %2843 = vst [vmem:[#allocation31_spill] sm:$0xff] %v2348_v32  ;;  %v955_v58 = vmax.f32 %v953_v44, %v2348_v32 }
 0x29d   : > { %v2354_v36 = vpop.f32.mrf.mxu1 }
 0x29e   : > { %v992_v5 = vmax.f32 %v990_v47, %v2354_v36 }
 0x29f   : > { %v2360_v46 = vpop.f32.mrf.mxu1 }
 0x2a0   : > { %2844 = vst [vmem:[#allocation32_spill] sm:$0xff] %v2360_v46  ;;  %v956_v0 = vmax.f32 %v954_v45, %v2360_v46  ;;  %v1006_v45 = vunpack.c.0.s8 %v1005_v20  ;;  %v2845_v46 = vlaneseq }
 0x2a1   : > { %v2366_v8 = vpop.f32.mrf.mxu1 }
 0x2a2   : > { %v957_v3 = vmax.f32 %v955_v58, %v956_v0  ;;  %v993_v59 = vmax.f32 %v991_v48, %v2366_v8  ;;  %v2371_v55 = vshrl.u32 %v2845_v46, 7 }
 0x2a4   : > { %v958_v39 = vrot.slane %v957_v3, 4  ;;  %v994_v16 = vmax.f32 %v992_v5, %v993_v59  ;;  %2846 = vst [vmem:[#allocation33_spill] sm:$0xff] %v2371_v55  ;;  %v2374_v48 = vsub.s32 %v1006_v45, %v2371_v55  ;;  %v2813_v46 = vsub.s32 1, %v2371_v55 }
 0x2a6   : > { %v959_v40 = vmax.f32 %v957_v3, %v958_v39  ;;  %v995_v24 = vrot.slane %v994_v16, 4 }
 0x2a8   : > { %v960_v12 = vrot.slane %v959_v40, 2  ;;  %v996_v62 = vmax.f32 %v994_v16, %v995_v24  ;;  %v2377_v16 = vld [vmem:[#allocation2] sm:$0x3]  ;;  %v2379_v24 = vpop.f32.mrf.mxu0 }
 0x2a9   : > { %2847 = vst [vmem:[#allocation34_spill] sm:$0xff] %v2379_v24 }
 0x2aa   : > { %v961_v43 = vmax.f32 %v959_v40, %v960_v12  ;;  %v997_v28 = vrot.slane %v996_v62, 2 }
 0x2ac   : > { %v962_v44 = vrot.slane %v961_v43, 1  ;;  %v998_v32 = vmax.f32 %v996_v62, %v997_v28  ;;  %v500_v62 = vpop.f32.mrf.mxu0 }
 0x2ad   : > { %1392 = vmatprep.mubr.f32.mxu0 %v500_v62  ;;  %v2849_v62 = vld [vmem:[#allocation11_spill] sm:$0xff] }
 0x2ae   : > { %v999_v47 = vrot.slane %v998_v32, 1  ;;  %v963_v58 = vmax.f32 %v961_v43, %v962_v44 }
 0x2b0   : > { %v1000_v0 = vmax.f32 %v998_v32, %v999_v47  ;;  %v2814_v32 = vsub.s32 0, %v2371_v55 }
 0x2b2   : > { %v1003_v3 = vcombine.low %v963_v58, %v1000_v0 }
 0x2b4   : > { %v1010_v5 = vrot.slane %v1003_v3, %v2374_v48 }
 0x2b6   : > { %v1017_v12 = vrot.slane %v1010_v5, %v2374_v48 }
 0x2b8   : > { %v2383_v20 = vmax.f32 %v2377_v16, %v1017_v12 }
 0x2ba   : > { %1419 = vst.msk [vmem:[#allocation2] sm:$0x3] %vm2180_vm2, %v2383_v20  ;;  %v2395_v59 = vrot.slane %v2383_v20, %v2814_v32  ;;  %v2400_v39 = vrot.slane %v2383_v20, %v2813_v46 }
 0x2bc   : > { %v1034_v40 = vsub.f32 %v2165_v49, %v2395_v59  ;;  %v1035_v42 = vsub.f32 %v2167_v50, %v2400_v39  ;;  %v1036_v43 = vsub.f32 %v2169_v51, %v2395_v59  ;;  %v1037_v44 = vsub.f32 %v2171_v52, %v2400_v39  ;;  %v2848_v50 = vld [vmem:[#allocation10_spill] sm:$0xff] }
 0x2bd   : > { %v1038_v45 = vsub.f32 %v2173_v53, %v2395_v59  ;;  %v1039_v47 = vsub.f32 %v2175_v54, %v2400_v39  ;;  %v1040_v49 = vsub.f32 %v2177_v56, %v2395_v59  ;;  %v1041_v5 = vsub.f32 %v2848_v50, %v2400_v39 }
 0x2be   : > { %v1098_v58 = vmul.f32 1.442695, %v1034_v40  ;;  %v1100_v0 = vmul.f32 1.442695, %v1035_v42  ;;  %v1102_v3 = vmul.f32 1.442695, %v1036_v43  ;;  %v1042_v51 = vsub.f32 %v2194_v60, %v2395_v59 }
 0x2bf   : > { %v1104_v12 = vmul.f32 1.442695, %v1037_v44  ;;  %v1106_v52 = vmul.f32 1.442695, %v1038_v45  ;;  %v1043_v53 = vsub.f32 %v2196_v61, %v2400_v39  ;;  %v1108_v54 = vmul.f32 1.442695, %v1039_v47 }
 0x2c0   : > { %1762 = vpow2.f32 %v1098_v58  ;;  %v1044_v40 = vsub.f32 %v2849_v62, %v2395_v59  ;;  %v1110_v56 = vmul.f32 1.442695, %v1040_v49  ;;  %v1045_v42 = vsub.f32 %v2200_v63, %v2400_v39  ;;  %v2850_v47 = vld [vmem:[#allocation12_spill] sm:$0xff] }
 0x2c1   : > { %1764 = vpow2.f32 %v1100_v0  ;;  %v1112_v43 = vmul.f32 1.442695, %v1041_v5  ;;  %v1046_v60 = vsub.f32 %v2202_v1, %v2395_v59  ;;  %v1114_v44 = vmul.f32 1.442695, %v1042_v51  ;;  %v2851_v5 = vld [vmem:[#allocation13_spill] sm:$0xff] }
 0x2c2   : > { %1766 = vpow2.f32 %v1102_v3  ;;  %v1047_v61 = vsub.f32 %v2204_v2, %v2400_v39  ;;  %v1116_v45 = vmul.f32 1.442695, %v1043_v53  ;;  %v1048_v58 = vsub.f32 %v2850_v47, %v2395_v59 }
 0x2c3   : > { %1768 = vpow2.f32 %v1104_v12  ;;  %v1118_v0 = vmul.f32 1.442695, %v1044_v40  ;;  %v1049_v63 = vsub.f32 %v2208_v4, %v2400_v39  ;;  %v1120_v49 = vmul.f32 1.442695, %v1045_v42 }
 0x2c4   : > { %1770 = vpow2.f32 %v1106_v52  ;;  %v1050_v1 = vsub.f32 %v2210_v6, %v2395_v59  ;;  %v1122_v3 = vmul.f32 1.442695, %v1046_v60  ;;  %v1051_v2 = vsub.f32 %v2212_v7, %v2400_v39 }
 0x2c5   : > { %1772 = vpow2.f32 %v1108_v54  ;;  %v1124_v50 = vmul.f32 1.442695, %v1047_v61  ;;  %v1052_v12 = vsub.f32 %v2851_v5, %v2395_v59  ;;  %v1126_v51 = vmul.f32 1.442695, %v1048_v58 }
 0x2c6   : > { %1774 = vpow2.f32 %v1110_v56  ;;  %v1053_v4 = vsub.f32 %v2216_v9, %v2400_v39  ;;  %v1128_v52 = vmul.f32 1.442695, %v1049_v63  ;;  %v1054_v6 = vsub.f32 %v2218_v10, %v2395_v59  ;;  %v2852_v56 = vld [vmem:[#allocation14_spill] sm:$0xff] }
 0x2c7   : > { %1776 = vpow2.f32 %v1112_v43  ;;  %v1130_v53 = vmul.f32 1.442695, %v1050_v1  ;;  %v1055_v7 = vsub.f32 %v2220_v11, %v2400_v39  ;;  %v1132_v62 = vmul.f32 1.442695, %v1051_v2 }
 0x2c8   : > { %1778 = vpow2.f32 %v1114_v44  ;;  %v1056_v42 = vsub.f32 %v2852_v56, %v2395_v59  ;;  %v1134_v9 = vmul.f32 1.442695, %v1052_v12  ;;  %v1057_v10 = vsub.f32 %v2224_v13, %v2400_v39  ;;  %v2853_v13 = vld [vmem:[#allocation15_spill] sm:$0xff] }
 0x2c9   : > { %1780 = vpow2.f32 %v1116_v45  ;;  %v1136_v60 = vmul.f32 1.442695, %v1053_v4  ;;  %v1058_v11 = vsub.f32 %v2226_v14, %v2395_v59  ;;  %v1138_v61 = vmul.f32 1.442695, %v1054_v6 }
 0x2ca   : > { %1782 = vpow2.f32 %v1118_v0  ;;  %v1059_v47 = vsub.f32 %v2228_v15, %v2400_v39  ;;  %v1140_v58 = vmul.f32 1.442695, %v1055_v7  ;;  %v1060_v63 = vsub.f32 %v2853_v13, %v2395_v59 }
 0x2cb   : > { %1784 = vpow2.f32 %v1120_v49  ;;  %v1142_v49 = vmul.f32 1.442695, %v1056_v42  ;;  %v1144_v2 = vmul.f32 1.442695, %v1057_v10  ;;  %v1062_v5 = vsub.f32 %v2234_v18, %v2395_v59 }
 0x2cc   : > { %1786 = vpow2.f32 %v1122_v3  ;;  %v1061_v3 = vsub.f32 %v2232_v17, %v2400_v39  ;;  %v1146_v12 = vmul.f32 1.442695, %v1058_v11  ;;  %v1148_v17 = vmul.f32 1.442695, %v1059_v47 }
 0x2cd   : > { %v2444_v54 = vpop.eup %1762  ;;  %1788 = vpow2.f32 %v1124_v50  ;;  %v1150_v18 = vmul.f32 1.442695, %v1060_v63  ;;  %v1067_v13 = vsub.f32 %v2244_v23, %v2400_v39 }
 0x2ce   : > { %v2448_v40 = vpop.eup %1764  ;;  %1790 = vpow2.f32 %v1126_v51  ;;  %v1152_v10 = vmul.f32 1.442695, %v1061_v3 }
 0x2cf   : > { %v2452_v43 = vpop.eup %1766  ;;  %1792 = vpow2.f32 %v1128_v52  ;;  %v2854_v52 = vld [vmem:[#allocation16_spill] sm:$0xff] }
 0x2d0   : > { %v2456_v44 = vpop.eup %1768  ;;  %1794 = vpow2.f32 %v1130_v53  ;;  %v1228_v1 = vadd.f32 %v2452_v43, %v2444_v54  ;;  %v1064_v6 = vsub.f32 %v2854_v52, %v2395_v59  ;;  %v1070_v52 = vsub.f32 %v2250_v26, %v2395_v59 }
 0x2d1   : > { %v2460_v45 = vpop.eup %1770  ;;  %1796 = vpow2.f32 %v1132_v62  ;;  %v1265_v15 = vadd.f32 %v2456_v44, %v2448_v40  ;;  %v1065_v62 = vsub.f32 %v2240_v21, %v2400_v39  ;;  %v1154_v21 = vmul.f32 1.442695, %v1062_v5 }
 0x2d2   : > { %v2464_v0 = vpop.eup %1772  ;;  %1798 = vpow2.f32 %v1134_v9  ;;  %v1229_v51 = vadd.f32 %v2460_v45, %v1228_v1  ;;  %v1063_v9 = vsub.f32 %v2236_v19, %v2400_v39  ;;  %v1158_v19 = vmul.f32 1.442695, %v1064_v6  ;;  %v2855_v1 = vld [vmem:[#allocation17_spill] sm:$0xff] }
 0x2d3   : > { %v2470_v14 = vpop.eup %1774  ;;  %1800 = vpow2.f32 %v1136_v60  ;;  %v1266_v53 = vadd.f32 %v2464_v0, %v1265_v15  ;;  %v1068_v3 = vsub.f32 %v2855_v1, %v2395_v59  ;;  %v1069_v5 = vsub.f32 %v2248_v25, %v2400_v39 }
 0x2d4   : > { %v2476_v50 = vpop.eup %1776  ;;  %1802 = vpow2.f32 %v1138_v61  ;;  %v1230_v56 = vadd.f32 %v2470_v14, %v1229_v51  ;;  %v1066_v61 = vsub.f32 %v2242_v22, %v2395_v59  ;;  %v1160_v22 = vmul.f32 1.442695, %v1065_v62 }
 0x2d5   : > { %v2481_v4 = vpop.eup %1778  ;;  %1804 = vpow2.f32 %v1140_v58  ;;  %v1267_v60 = vadd.f32 %v2476_v50, %v1266_v53  ;;  %v1156_v23 = vmul.f32 1.442695, %v1063_v9  ;;  %v1071_v62 = vsub.f32 %v2252_v27, %v2400_v39  ;;  %v2856_v9 = vld [vmem:[#allocation18_spill] sm:$0xff] }
 0x2d6   : > { %v2486_v7 = vpop.eup %1780  ;;  %1806 = vpow2.f32 %v1142_v49  ;;  %v1231_v47 = vadd.f32 %v2481_v4, %v1230_v56  ;;  %v1162_v6 = vmul.f32 1.442695, %v1066_v61  ;;  %v1164_v25 = vmul.f32 1.442695, %v1067_v13 }
 0x2d7   : > { %v2491_v42 = vpop.eup %1782  ;;  %1808 = vpow2.f32 %v1144_v2  ;;  %v1268_v63 = vadd.f32 %v2486_v7, %v1267_v60  ;;  %v1166_v26 = vmul.f32 1.442695, %v1068_v3  ;;  %v1168_v27 = vmul.f32 1.442695, %v1069_v5 }
 0x2d8   : > { %v2496_v11 = vpop.eup %1784  ;;  %1810 = vpow2.f32 %v1146_v12  ;;  %v1232_v2 = vadd.f32 %v2491_v42, %v1231_v47 }
 0x2d9   : > { %v2501_v58 = vpop.eup %1786  ;;  %1812 = vpow2.f32 %v1148_v17  ;;  %v1269_v12 = vadd.f32 %v2496_v11, %v1268_v63  ;;  %v1170_v63 = vmul.f32 1.442695, %v1070_v52 }
 0x2da   : > { %v2506_v49 = vpop.eup %1788  ;;  %1814 = vpow2.f32 %v1150_v18  ;;  %v1233_v17 = vadd.f32 %v2501_v58, %v1232_v2 }
 0x2db   : > { %v2511_v15 = vpop.eup %1790  ;;  %1816 = vpow2.f32 %v1152_v10  ;;  %v1270_v18 = vadd.f32 %v2506_v49, %v1269_v12  ;;  %v1072_v10 = vsub.f32 %v2856_v9, %v2395_v59 }
 0x2dc   : > { %v2516_v51 = vpop.eup %1792  ;;  %1818 = vpow2.f32 %v1154_v21  ;;  %v1234_v60 = vadd.f32 %v2511_v15, %v1233_v17  ;;  %v1073_v21 = vsub.f32 %v2256_v29, %v2400_v39  ;;  %v1172_v29 = vmul.f32 1.442695, %v1071_v62 }
 0x2dd   : > { %v2521_v53 = vpop.eup %1794  ;;  %1820 = vpow2.f32 %v1158_v19  ;;  %v1271_v47 = vadd.f32 %v2516_v51, %v1270_v18  ;;  %v1074_v19 = vsub.f32 %v2258_v30, %v2395_v59  ;;  %v1174_v30 = vmul.f32 1.442695, %v1072_v10 }
 0x2de   : > { %v2526_v56 = vpop.eup %1796  ;;  %1822 = vpow2.f32 %v1160_v22  ;;  %v1235_v1 = vadd.f32 %v2521_v53, %v1234_v60  ;;  %v1075_v22 = vsub.f32 %v2260_v31, %v2400_v39  ;;  %v1077_v17 = vsub.f32 %v2264_v33, %v2400_v39 }
 0x2df   : > { %v2531_v61 = vpop.eup %1798  ;;  %1824 = vpow2.f32 %v1156_v23  ;;  %v1272_v2 = vadd.f32 %v2526_v56, %v1271_v47  ;;  %v2857_v23 = vld [vmem:[#allocation19_spill] sm:$0xff]  ;;  %v1176_v31 = vmul.f32 1.442695, %v1073_v21  ;;  %v1078_v18 = vsub.f32 %v2266_v34, %v2395_v59  ;;  %v2858_v47 = vld [vmem:[#allocation20_spill] sm:$0xff] }
 0x2e0   : > { %v2536_v13 = vpop.eup %1800  ;;  %1826 = vpow2.f32 %v1162_v6  ;;  %v1076_v12 = vsub.f32 %v2857_v23, %v2395_v59  ;;  %v1236_v52 = vadd.f32 %v2531_v61, %v1235_v1  ;;  %v1178_v9 = vmul.f32 1.442695, %v1074_v19 }
 0x2e1   : > { %v2541_v3 = vpop.eup %1802  ;;  %1828 = vpow2.f32 %v1164_v25  ;;  %v1273_v62 = vadd.f32 %v2536_v13, %v1272_v2  ;;  %v1079_v60 = vsub.f32 %v2268_v35, %v2400_v39  ;;  %v1180_v33 = vmul.f32 1.442695, %v1075_v22 }
 0x2e2   : > { %v2546_v5 = vpop.eup %1804  ;;  %1830 = vpow2.f32 %v1166_v26  ;;  %v1237_v10 = vadd.f32 %v2541_v3, %v1236_v52  ;;  %v1080_v1 = vsub.f32 %v2858_v47, %v2395_v59  ;;  %v1182_v34 = vmul.f32 1.442695, %v1076_v12 }
 0x2e3   : > { %v2551_v6 = vpop.eup %1806  ;;  %1832 = vpow2.f32 %v1168_v27  ;;  %v1274_v21 = vadd.f32 %v2546_v5, %v1273_v62  ;;  %v1081_v2 = vsub.f32 %v2272_v37, %v2400_v39  ;;  %v1184_v23 = vmul.f32 1.442695, %v1077_v17  ;;  %v2859_v17 = vld [vmem:[#allocation21_spill] sm:$0xff] }
 0x2e4   : > { %v2556_v25 = vpop.eup %1808  ;;  %1834 = vpow2.f32 %v1170_v63  ;;  %v1238_v19 = vadd.f32 %v2551_v6, %v1237_v10  ;;  %v1186_v52 = vmul.f32 1.442695, %v1078_v18  ;;  %v1083_v12 = vsub.f32 %v2280_v41, %v2400_v39  ;;  %v2860_v18 = vld [vmem:[#allocation22_spill] sm:$0xff]  ;;  %v2861_v41 = vld [vmem:[#allocation23_spill] sm:$0xff] }
 0x2e5   : > { %v2561_v26 = vpop.eup %1810  ;;  %1836 = vpow2.f32 %v1172_v29  ;;  %v1275_v35 = vadd.f32 %v2556_v25, %v1274_v21  ;;  %v1082_v29 = vsub.f32 %v2274_v38, %v2395_v59  ;;  %v1188_v10 = vmul.f32 1.442695, %v1079_v60 }
 0x2e6   : > { %v2566_v27 = vpop.eup %1812  ;;  %1838 = vpow2.f32 %v1174_v30  ;;  %v1239_v62 = vadd.f32 %v2561_v26, %v1238_v19  ;;  %v1084_v21 = vsub.f32 %v2859_v17, %v2395_v59  ;;  %v1190_v47 = vmul.f32 1.442695, %v1080_v1  ;;  %v2862_v1 = vld [vmem:[#allocation24_spill] sm:$0xff] }
 0x2e7   : > { %v1815_v63 = vpop.eup %1814  ;;  %1840 = vpow2.f32 %v1176_v31  ;;  %v1276_v37 = vadd.f32 %v2566_v27, %v1275_v35  ;;  %v1192_v19 = vmul.f32 1.442695, %v1081_v2  ;;  %v1086_v60 = vsub.f32 %v2861_v41, %v2395_v59  ;;  %v2863_v2 = vld [vmem:[#allocation25_spill] sm:$0xff] }
 0x2e8   : > { %v1817_v22 = vpop.eup %1816  ;;  %1842 = vpow2.f32 %v1178_v9  ;;  %v1240_v46 = vadd.f32 %v1815_v63, %v1239_v62  ;;  %v1085_v9 = vsub.f32 %v2860_v18, %v2400_v39  ;;  %v1196_v62 = vmul.f32 1.442695, %v1083_v12  ;;  %v2865_v12 = vld [vmem:[#allocation27_spill] sm:$0xff] }
 0x2e9   : > { %v1819_v30 = vpop.eup %1818  ;;  %1844 = vpow2.f32 %v1180_v33  ;;  %v1277_v32 = vadd.f32 %v1817_v22, %v1276_v37  ;;  %v1194_v33 = vmul.f32 1.442695, %v1082_v29  ;;  %v1088_v37 = vsub.f32 %v2863_v2, %v2395_v59  ;;  %v2864_v29 = vld [vmem:[#allocation26_spill] sm:$0xff] }
 0x2ea   : > { %v1821_v31 = vpop.eup %1820  ;;  %1846 = vpow2.f32 %v1182_v34  ;;  %v1241_v35 = vadd.f32 %v1819_v30, %v1240_v46  ;;  %v1087_v34 = vsub.f32 %v2862_v1, %v2400_v39  ;;  %v1198_v18 = vmul.f32 1.442695, %v1084_v21 }
 0x2eb   : > { %v1823_v38 = vpop.eup %1822  ;;  %1848 = vpow2.f32 %v1184_v23  ;;  %v1089_v41 = vsub.f32 %v2864_v29, %v2400_v39  ;;  %v1200_v1 = vmul.f32 1.442695, %v1085_v9  ;;  %v1090_v24 = vsub.f32 %v2865_v12, %v2395_v59  ;;  %v2867_v9 = vld [vmem:[#allocation29_spill] sm:$0xff] }
 0x2ec   : > { %v1825_v28 = vpop.eup %1824  ;;  %1850 = vpow2.f32 %v1186_v52  ;;  %1328 = vmatprep.subr.mxu0 %v1823_v38  ;;  %v1242_v52 = vadd.f32 %v1821_v31, %v1241_v35  ;;  %v1202_v2 = vmul.f32 1.442695, %v1086_v60  ;;  %v1092_v35 = vsub.f32 %v2867_v9, %v2395_v59 }
 0x2ed   : > { %v2586_v55 = vpop.eup %1826  ;;  %1852 = vpow2.f32 %v1188_v10  ;;  %v1278_v17 = vadd.f32 %v1825_v28, %v1277_v32  ;;  %1329 = vmatpush1.msra.mxu0 %v1821_v31  ;;  %v2866_v31 = vld [vmem:[#allocation28_spill] sm:$0xff]  ;;  %v1206_v60 = vmul.f32 1.442695, %v1088_v37  ;;  %v1210_v29 = vmul.f32 1.442695, %v1090_v24 }
 0x2ee   : > { %v2590_v23 = vpop.eup %1828  ;;  %1854 = vpow2.f32 %v1190_v47  ;;  %1330 = vmatprep.subr.mxu0 %v1825_v28  ;;  %v1243_v21 = vadd.f32 %v2586_v55, %v1242_v52  ;;  %v1091_v47 = vsub.f32 %v2866_v31, %v2400_v39  ;;  %v1097_v24 = vsub.f32 %v2366_v8, %v2400_v39 }
 0x2ef   : > { %v2594_v46 = vpop.eup %1830  ;;  %1856 = vpow2.f32 %v1192_v19  ;;  %v1279_v10 = vadd.f32 %v1823_v38, %v1278_v17  ;;  %1331 = vmatpush1.msra.mxu0 %v1819_v30  ;;  %v1204_v19 = vmul.f32 1.442695, %v1087_v34  ;;  %v2868_v17 = vld [vmem:[#allocation30_spill] sm:$0xff]  ;;  %v1208_v34 = vmul.f32 1.442695, %v1089_v41 }
 0x2f0   : > { %v2598_v32 = vpop.eup %1832  ;;  %1858 = vpow2.f32 %v1194_v33  ;;  %1332 = vmatprep.subr.mxu0 %v1817_v22  ;;  %v1244_v33 = vadd.f32 %v2594_v46, %v1243_v21  ;;  %v1095_v41 = vsub.f32 %v2354_v36, %v2400_v39  ;;  %v2870_v36 = vld [vmem:[#allocation32_spill] sm:$0xff] }
 0x2f1   : > { %v2603_v28 = vpop.eup %1834  ;;  %1860 = vpow2.f32 %v1196_v62  ;;  %v1280_v38 = vadd.f32 %v2590_v23, %v1279_v10  ;;  %1333 = vmatpush1.msra.mxu0 %v1815_v63  ;;  %v1093_v62 = vsub.f32 %v2868_v17, %v2400_v39  ;;  %v1096_v31 = vsub.f32 %v2870_v36, %v2395_v59 }
 0x2f2   : > { %v2608_v30 = vpop.eup %1836  ;;  %1862 = vpow2.f32 %v1198_v18  ;;  %1334 = vmatprep.subr.mxu0 %v2566_v27  ;;  %v2869_v18 = vld [vmem:[#allocation31_spill] sm:$0xff]  ;;  %v1245_v27 = vadd.f32 %v2603_v28, %v1244_v33 }
 0x2f3   : > { %v2614_v22 = vpop.eup %1838  ;;  %1864 = vpow2.f32 %v1200_v1  ;;  %v1281_v63 = vadd.f32 %v2598_v32, %v1280_v38  ;;  %1335 = vmatpush1.msra.mxu0 %v2561_v26  ;;  %v1094_v37 = vsub.f32 %v2869_v18, %v2395_v59  ;;  %v1212_v1 = vmul.f32 1.442695, %v1091_v47 }
 0x2f4   : > { %v2620_v52 = vpop.eup %1840  ;;  %1866 = vpow2.f32 %v1202_v2  ;;  %1336 = vmatprep.subr.mxu0 %v2556_v25  ;;  %v1214_v2 = vmul.f32 1.442695, %v1092_v35  ;;  %v1246_v25 = vadd.f32 %v2614_v22, %v1245_v27  ;;  %v1216_v47 = vmul.f32 1.442695, %v1093_v62 }
 0x2f5   : > { %v2626_v10 = vpop.eup %1842  ;;  %1868 = vpow2.f32 %v1204_v19  ;;  %v1282_v26 = vadd.f32 %v2608_v30, %v1281_v63  ;;  %1337 = vmatpush1.msra.mxu0 %v2551_v6  ;;  %v1218_v8 = vmul.f32 1.442695, %v1094_v37  ;;  %v1220_v38 = vmul.f32 1.442695, %v1095_v41 }
 0x2f6   : > { %v2632_v12 = vpop.eup %1844  ;;  %1870 = vpow2.f32 %v1206_v60  ;;  %1338 = vmatprep.subr.mxu0 %v2546_v5  ;;  %v1247_v39 = vadd.f32 %v2626_v10, %v1246_v25 }
 0x2f7   : > { %v2638_v21 = vpop.eup %1846  ;;  %1872 = vpow2.f32 %v1208_v34  ;;  %v1283_v6 = vadd.f32 %v2620_v52, %v1282_v26  ;;  %1339 = vmatpush1.msra.mxu0 %v2541_v3  ;;  %v1224_v3 = vmul.f32 1.442695, %v1097_v24 }
 0x2f8   : > { %v2644_v19 = vpop.eup %1848  ;;  %1874 = vpow2.f32 %v1210_v29  ;;  %1340 = vmatprep.subr.mxu0 %v2536_v13  ;;  %v1248_v35 = vadd.f32 %v2638_v21, %v1247_v39  ;;  %v1222_v13 = vmul.f32 1.442695, %v1096_v31 }
 0x2f9   : > { %v2648_v5 = vpop.eup %1850  ;;  %1876 = vpow2.f32 %v1212_v1  ;;  %v1284_v59 = vadd.f32 %v2632_v12, %v1283_v6  ;;  %1341 = vmatpush1.msra.mxu0 %v2531_v61 }
 0x2fa   : > { %v2652_v9 = vpop.eup %1852  ;;  %1878 = vpow2.f32 %v1214_v2  ;;  %1342 = vmatprep.subr.mxu0 %v2526_v56  ;;  %v1249_v61 = vadd.f32 %v2648_v5, %v1248_v35 }
 0x2fb   : > { %v2656_v60 = vpop.eup %1854  ;;  %1880 = vpow2.f32 %v1216_v47  ;;  %v1285_v33 = vadd.f32 %v2644_v19, %v1284_v59  ;;  %1343 = vmatpush1.msra.mxu0 %v2521_v53 }
 0x2fc   : > { %v2660_v17 = vpop.eup %1856  ;;  %1882 = vpow2.f32 %v1218_v8  ;;  %1344 = vmatprep.subr.mxu0 %v2516_v51  ;;  %v1250_v63 = vadd.f32 %v2656_v60, %v1249_v61 }
 0x2fd   : > { %v2664_v62 = vpop.eup %1858  ;;  %1884 = vpow2.f32 %v1220_v38  ;;  %v1286_v56 = vadd.f32 %v2652_v9, %v1285_v33  ;;  %1345 = vmatpush1.msra.mxu0 %v2511_v15 }
 0x2fe   : > { %v2668_v34 = vpop.eup %1860  ;;  %1886 = vpow2.f32 %v1224_v3  ;;  %1346 = vmatprep.subr.mxu0 %v2506_v49  ;;  %v1251_v37 = vadd.f32 %v2664_v62, %v1250_v63 }
 0x2ff   : > { %v2672_v53 = vpop.eup %1862  ;;  %1888 = vpow2.f32 %v1222_v13  ;;  %v1287_v18 = vadd.f32 %v2660_v17, %v1286_v56  ;;  %1347 = vmatpush1.msra.mxu0 %v2501_v58 }
 0x300   : > { %v2676_v51 = vpop.eup %1864  ;;  %1348 = vmatprep.subr.mxu0 %v2496_v11  ;;  %v1252_v49 = vadd.f32 %v2672_v53, %v1251_v37 }
 0x301   : > { %v1867_v15 = vpop.eup %1866  ;;  %v1288_v29 = vadd.f32 %v2668_v34, %v1287_v18  ;;  %1349 = vmatpush1.msra.mxu0 %v2491_v42 }
 0x302   : > { %v1869_v27 = vpop.eup %1868  ;;  %1350 = vmatprep.subr.mxu0 %v2486_v7  ;;  %v1253_v26 = vadd.f32 %v1867_v15, %v1252_v49 }
 0x303   : > { %v1871_v41 = vpop.eup %1870  ;;  %v1289_v1 = vadd.f32 %v2676_v51, %v1288_v29  ;;  %1351 = vmatpush1.msra.mxu0 %v2481_v4 }
 0x304   : > { %v1873_v58 = vpop.eup %1872  ;;  %1352 = vmatprep.subr.mxu0 %v2476_v50  ;;  %v1254_v42 = vadd.f32 %v1871_v41, %v1253_v26 }
 0x305   : > { %v1875_v11 = vpop.eup %1874  ;;  %v1290_v24 = vadd.f32 %v1869_v27, %v1289_v1  ;;  %1353 = vmatpush1.msra.mxu0 %v2470_v14 }
 0x306   : > { %v1877_v2 = vpop.eup %1876  ;;  %1354 = vmatprep.subr.mxu0 %v2464_v0  ;;  %v1255_v31 = vadd.f32 %v1875_v11, %v1254_v42 }
 0x307   : > { %v1879_v25 = vpop.eup %1878  ;;  %v1291_v36 = vadd.f32 %v1873_v58, %v1290_v24  ;;  %1355 = vmatpush1.msra.mxu0 %v2460_v45  ;;  %v2871_v45 = vsub.f32 %v2377_v16, %v2383_v20  ;;  %v1514_v24 = vstv %s1513_s5 }
 0x308   : > { %v1881_v7 = vpop.eup %1880  ;;  %1356 = vmatprep.subr.mxu0 %v2456_v44  ;;  %v1256_v6 = vadd.f32 %v1879_v25, %v1255_v31 }
 0x309   : > { %v1883_v4 = vpop.eup %1882  ;;  %v1292_v47 = vadd.f32 %v1877_v2, %v1291_v36  ;;  %1357 = vmatpush1.msra.mxu0 %v2452_v43  ;;  %v1021_v38 = vmul.f32 1.442695, %v2871_v45 }
 0x30a   : > { %v1885_v50 = vpop.eup %1884  ;;  %1358 = vmatprep.subr.mxu0 %v2448_v40  ;;  %v1257_v39 = vadd.f32 %v1883_v4, %v1256_v6 }
 0x30b   : > { %v1887_v14 = vpop.eup %1886  ;;  %v1293_v8 = vadd.f32 %v1881_v7, %v1292_v47  ;;  %1359 = vmatpush1.msra.mxu0 %v2444_v54  ;;  %1890 = vpow2.f32 %v1021_v38 }
 0x30c   : > { %v1889_v0 = vpop.eup %1888  ;;  %1360 = vmatprep.subr.mxu0 %v1887_v14 }
 0x30d   : > { %v1294_v44 = vadd.f32 %v1885_v50, %v1293_v8  ;;  %1361 = vmatpush2.msra.mxu0 %v1889_v0  ;;  %v1258_v59 = vadd.f32 %v1889_v0, %v1257_v39 }
 0x30e   : > { %1362 = vmatprep.subr.mxu0 %v1885_v50 }
 0x30f   : > { %v1295_v43 = vadd.f32 %v1887_v14, %v1294_v44  ;;  %1363 = vmatpush2.msra.mxu0 %v1883_v4  ;;  %v1259_v3 = vrot.slane %v1258_v59, 4 }
 0x310   : > { %1364 = vmatprep.subr.mxu0 %v1881_v7 }
 0x311   : > { %v1296_v40 = vrot.slane %v1295_v43, 4  ;;  %1365 = vmatpush2.msra.mxu0 %v1879_v25  ;;  %v1260_v35 = vadd.f32 %v1259_v3, %v1258_v59 }
 0x312   : > { %1366 = vmatprep.subr.mxu0 %v1877_v2 }
 0x313   : > { %v1297_v54 = vadd.f32 %v1296_v40, %v1295_v43  ;;  %1367 = vmatpush2.msra.mxu0 %v1875_v11  ;;  %v1261_v13 = vrot.slane %v1260_v35, 2 }
 0x314   : > { %1368 = vmatprep.subr.mxu0 %v1873_v58 }
 0x315   : > { %v1298_v33 = vrot.slane %v1297_v54, 2  ;;  %1369 = vmatpush2.msra.mxu0 %v1871_v41  ;;  %v1262_v16 = vadd.f32 %v1261_v13, %v1260_v35  ;;  %v2875_v41 = vld [vmem:[#allocation33_spill] sm:$0xff] }
 0x316   : > { %1370 = vmatprep.subr.mxu0 %v1869_v27  ;;  %v1226_v27 = vld [vmem:[#allocation3] sm:$0x3]  ;;  %v2876_v1 = vsub.s32 0, %v2875_v41  ;;  %v2877_v26 = vsub.s32 1, %v2875_v41 }
 0x317   : > { %v1299_v20 = vadd.f32 %v1298_v33, %v1297_v54  ;;  %1371 = vmatpush2.msra.mxu0 %v1867_v15  ;;  %v1263_v61 = vrot.slane %v1262_v16, 1 }
 0x318   : > { %1372 = vmatprep.subr.mxu0 %v2676_v51  ;;  %v1891_v29 = vpop.eup %1890 }
 0x319   : > { %v1300_v56 = vrot.slane %v1299_v20, 1  ;;  %1373 = vmatpush2.msra.mxu0 %v2672_v53  ;;  %v1264_v63 = vadd.f32 %v1263_v61, %v1262_v16  ;;  %v1227_v53 = vmul.f32 %v1891_v29, %v1226_v27 }
 0x31a   : > { %1374 = vmatprep.subr.mxu0 %v2668_v34 }
 0x31b   : > { %v1301_v18 = vadd.f32 %v1300_v56, %v1299_v20  ;;  %1375 = vmatpush2.msra.mxu0 %v2664_v62 }
 0x31c   : > { %1376 = vmatprep.subr.mxu0 %v2660_v17 }
 0x31d   : > { %v1304_v37 = vcombine.low %v1264_v63, %v1301_v18  ;;  %1377 = vmatpush2.msra.mxu0 %v2656_v60 }
 0x31e   : > { %1378 = vmatprep.subr.mxu0 %v2652_v9 }
 0x31f   : > { %v1311_v51 = vrot.slane %v1304_v37, %v2374_v48  ;;  %1379 = vmatpush2.msra.mxu0 %v2648_v5 }
 0x320   : > { %1380 = vmatprep.subr.mxu0 %v2644_v19 }
 0x321   : > { %v1318_v34 = vrot.slane %v1311_v51, %v2374_v48  ;;  %1381 = vmatpush2.msra.mxu0 %v2638_v21 }
 0x322   : > { %1382 = vmatprep.subr.mxu0 %v2632_v12  ;;  %v1894_v12 = vld [vmem:[%s2071_s10] sm:$0xff]  ;;  %s1551_s10 = sshll.u32 %s229_s9, 4  ;;  %s1552_s10 = int_to_ptr.vmem [resolvable:$true] %s1551_s10 }
 0x323   : > { %v1320_v17 = vadd.f32 %v1318_v34, %v1227_v53  ;;  %1383 = vmatpush2.msra.mxu0 %v2626_v10  ;;  %v2872_v10 = vld [vmem:[#allocation34_spill] sm:$0xff]  ;;  %s1895_s15 = scalar_lea.vmem %s1552_s10, 32  ;;  %p1902_p1 = scmp.lt.s32.totalorder %s1552_s10, %s1900_s16 }
 0x324   : > { %1384 = vmatprep.subr.mxu0 %v2620_v52  ;;  %v2873_v52 = vld [vmem:[#allocation9_spill] sm:$0xff]  ;;  %p1896_p12 = scmp.ne.s32.totalorder %s1552_s10, %s1895_s15  ;;  %p1903_p2 = scmp.lt.s32.totalorder %s1901_s3, %s1895_s15 }
 0x325   : > { %1325 = vst.msk [vmem:[#allocation3] sm:$0x3] %vm2180_vm2, %v1320_v17  ;;  %1385 = vmatpush2.msra.mxu0 %v2614_v22  ;;  %v2874_v22 = vmov 0.0  }
 0x326   : > { %1386 = vmatprep.subr.mxu0 %v2608_v30  ;;  %v1326_v30 = vld [vmem:[#allocation4] sm:$0x3]  ;;  %p1897_p13 = pnand %p1896_p12, %p2046_p4  ;;  %p1904_p3 = por %p1903_p2, %p1902_p1 }
 0x327   : > { %1387 = vmatpush2.msra.mxu0 %v2603_v28  ;;  %v1327_v19 = vmul.f32 %v1891_v29, %v1326_v30 }
 0x328   : > { %1388 = vmatprep.subr.mxu0 %v2598_v32  ;;  %v1423_v32 = vld [vmem:[%s2784_s2 + $0x19] sm:$0x1]  ;;  %p1898_p0 = pneg %p1897_p13 }
 0x329   : > { %1389 = vmatpush2.msra.mxu0 %v2594_v46 }
 0x32a   : > { %1390 = vmatprep.subr.mxu0 %v2590_v23  ;;  %p1905_p5 = pnand %p1904_p3, %p1898_p0 }
 0x32b   : > { %1391 = vmatpush2.msra.mxu0 %v2586_v55 }
 0x32c   : > { %1393 = vmatmul.mubr.f32.vlgmr.msra.gmra.mxu0 %v2872_v10  ;;  %1689 = vmatprep.subr.msk.mxu0 %vm273_vm0, %v2873_v52  ;;  %v1424_v55 = vld [vmem:[#allocation3] sm:$0x3] }
 0x32d   : > { %1690 = vmatpush1.msk.msra.mxu0 %vm273_vm0, %v1894_v12  ;;  %1506 = vmatprep.mubr.f32.mxu0 %v2874_v22  ;;  %1892 = vrcp.f32 %v1424_v55 }
 0x330   : > { %1691 = vmatmul.mubr.msk.f32.vlgmr.msra.gmra.mxu0 %vm269_vm1, %v1423_v32 }
 0x33a   : > { %v1893_v60 = vpop.eup %1892 }
 0x3ec   : > { %v1394_v46 = vpop.f32.mrf.mxu0 }
 0x3ee   : > { %v1396_v23 = vpop.f32.mrf.mxu0 }
 0x3ef   : > { %v1401_v28 = vcombine.low %v1394_v46, %v1396_v23 }
 0x3f0   : > { %v1508_v15 = vpop.f32.mrf.mxu0 }
 0x3f1   : > { %v1408_v21 = vrot.slane %v1401_v28, %v2374_v48 }
 0x3f2   : > { %v1510_v2 = vpop.f32.mrf.mxu0 }
 0x3f3   : > { %v1415_v5 = vrot.slane %v1408_v21, %v2374_v48 }
 0x3f5   : > { %v1417_v9 = vadd.f32 %v1415_v5, %v1327_v19 }
 0x3f7   : > { %1418 = vst.msk [vmem:[#allocation4] sm:$0x3] %vm2180_vm2, %v1417_v9 }
 0x3fe   : > { %v1426_v62 = vld [vmem:[#allocation4] sm:$0x3] }
 0x3ff   : > { %v1427_v49 = vmul.f32 %v1893_v60, %v1426_v62 }
 0x401   : > { %v1432_v58 = vrot.slane %v1427_v49, %v2876_v1  ;;  %v1436_v11 = vrot.slane %v1427_v49, %v2877_v26 }
 0x403   : > { %v1509_v42 = vadd.f32 %v1508_v15, %v1432_v58  ;;  %v1511_v25 = vadd.f32 %v1510_v2, %v1436_v11 }
 0x405   : > { %v1515_v36 = vadd.f32 %v1514_v24, %v1509_v42  ;;  %v1516_v7 = vadd.f32 %v1514_v24, %v1511_v25 }
 0x407   : > { %v1519_v31 = vcombine.low %v1515_v36, %v1516_v7 }
 0x409   : > { %v1526_v4 = vrot.slane %v1519_v31, %v2374_v48 }
 0x40b   : > { %v1533_v47 = vrot.slane %v1526_v4, %v2374_v48 }
 0x40d   : > { %1535 = vst.msk [vmem:[%s229_s9] sm:$0x3] %vm2180_vm2, %v1533_v47 }
 0x40e   : > { %1908 = shalt.err (!%p1905_p5)
}
 0x40f   : > { %s1909_s23 = scalar_lea.hbm %s1549_s13, 32  ;;  %s1913_s30 = scalar_lea.hbm %s2786_s4, 64 }
 0x410   : > { %p1910_p6 = scmp.ne.s32.totalorder %s1549_s13, %s1909_s23  ;;  %p1914_p10 = scmp.lt.s32.totalorder %s1549_s13, %s2786_s4 }
 0x411   : > { %p1915_p11 = scmp.lt.s32.totalorder %s1913_s30, %s1909_s23 }
 0x412   : > { %p1911_p7 = pnand %p1910_p6, %p2046_p4 }
 0x413   : > { %p1916_p12 = por %p1915_p11, %p1914_p10 }
 0x414   : > { %p1912_p9 = pneg %p1911_p7 }
 0x416   : > { %p1917_p13 = pnand %p1916_p12, %p1912_p9 }
 0x418   : > { %1920 = shalt.err (!%p1917_p13)
}
 0x419   : > { %1700 = dma.vmem_to_hbm [thread:$0]  (%p2046_p4), %s1552_s10, 32, %s1549_s13, %s1537_s14  }
 0x41a PF: > { %p1706_p0 = scmp.ge.s32.totalorder %s1971_s22, 2  ;;  %s1563_s7 = sand.u32 1, %s1951_s17  }
 0x41b   : > { %s1564_s8 = scalar_lea.sflag [#allocation7], %s1563_s7 }
 0x41c   : > { %p1703_p1 = pnand %p1706_p0, %p2053_p8 }
 0x41e   : > { %p1704_p2 = pneg %p1703_p1 }
 0x420   : > { %1946 = dma.done.wait (%p1704_p2), %s1564_s8, 32  }
 0x421   : > { %1948 = vsyncadd (%p1704_p2), %s1564_s8, 4294967264  ;;  %s18_s22 = sadd.s32 1, %s1971_s22   ;;  %s2878_s17 = smov %s1955_s18 }
 0x422   : > { %p15_p3 = scmp.ge.s32.totalorder %s18_s22, 4   ;;  %s2879_s18 = smov %s1959_s19 }
 0x423   : > { %s2880_s19 = smov %s2059_s29  ;;  %s2881_s20 = smov %s1967_s21 }
 0x424   : > { %s2882_s21 = smov %s2884_s24  ;;  %17 = sbr.rel (!%p15_p3) target bundleno = 6 (0x6), region = 82 }
 0x429   :  { %1569 = vsyncpa [#allocation7], 1 }
 0x42a   :  { %1571 = vsyncpa [#allocation7 + $0x1], 1 }

</bundles_post_ra>
